<compile_context>
chip_gen: v5e
topology: v5e:2x2
jax: 0.10.0
libtpu: 0.0.40
codegen_flags: <defaults>
</compile_context>

<pallas_src>
import functools

import jax
import jax.numpy as jnp
from jax import lax
from jax.experimental import pallas as pl
from jax.experimental.pallas import tpu as pltpu

LANE = 128

_COMPILER_PARAMS = pltpu.CompilerParams(
    dimension_semantics=("parallel",),
    vmem_limit_bytes=64 * 1024 * 1024,
)


def _round_up(x, m):
    return (x + m - 1) // m * m


# ---------------------------------------------------------------------------
# In-kernel helpers
# ---------------------------------------------------------------------------
def _im2col_3x3(x, Ho, Wo, stride):
    """x: (Hp, Wp, C) spatially padded tile -> (Ho*Wo, 9*C) patch matrix.

    All channel slabs are 128-lane aligned, so the concat along the lane axis and
    the leading-dim merge reshape are layout-free.
    """
    taps = []
    for kh in range(3):
        for kw in range(3):
            if stride == 1:
                t = x[kh:kh + Ho, kw:kw + Wo, :]
            else:
                # TODO(synk): for stride>1, pre-split even/odd row/col phases in the
                # wrapper so these become contiguous slabs instead of strided slices.
                t = x[kh:kh + stride * (Ho - 1) + 1:stride,
                      kw:kw + stride * (Wo - 1) + 1:stride, :]
            taps.append(t)
    patch = jnp.concatenate(taps, axis=-1)          # (Ho, Wo, 9*C)
    return patch.reshape(Ho * Wo, patch.shape[-1])  # (Ho*Wo, 9*C)


# ---------------------------------------------------------------------------
# Pallas kernels
# ---------------------------------------------------------------------------
def _conv1_kernel(x_ref, w_ref, b_ref, o_ref, *, stride):
    # x_ref: (1, Hp, Wp, Cin)   spatially padded input, one batch element
    # w_ref: (9*Cin, Cout)      3x3 taps flattened, BN scale pre-folded
    # b_ref: (1, Cout)          folded BN bias (includes conv bias)
    # o_ref: (1, Ho+2, Wo+2, Cout)  conv+BN+ReLU written into the interior,
    #                               zero spatial halo (so conv2 needs no jnp.pad)
    _, Hop, Wop, Cout = o_ref.shape
    Ho, Wo = Hop - 2, Wop - 2
    patch = _im2col_3x3(x_ref[0], Ho, Wo, stride)              # (Ho*Wo, 9*Cin)
    y = jnp.dot(patch, w_ref[...], preferred_element_type=jnp.float32)
    y = jnp.maximum(y + b_ref[...], 0.0)
    o_ref[...] = jnp.zeros_like(o_ref)
    o_ref[0, 1:Ho + 1, 1:Wo + 1, :] = y.reshape(Ho, Wo, Cout).astype(o_ref.dtype)


def _conv2_shortcut_kernel(h_ref, x_ref, w2_ref, b2_ref, ws_ref, bs_ref, o_ref,
                           *, stride):
    # Fused: conv2(h)+BN  +  shortcut_conv(x)+BN  -> add -> ReLU
    # h_ref: (1, Ho+2, Wo+2, C)   zero-haloed conv1 output
    # x_ref: (1, Hp, Wp, Cin)     spatially padded block input
    _, Ho, Wo, C = o_ref.shape
    p2 = _im2col_3x3(h_ref[0], Ho, Wo, 1)
    y = jnp.dot(p2, w2_ref[...], preferred_element_type=jnp.float32) + b2_ref[...]
    ps = _im2col_3x3(x_ref[0], Ho, Wo, stride)
    y = y + jnp.dot(ps, ws_ref[...], preferred_element_type=jnp.float32) + bs_ref[...]
    y = jnp.maximum(y, 0.0)
    o_ref[0] = y.reshape(Ho, Wo, C).astype(o_ref.dtype)


def _conv2_identity_kernel(h_ref, x_ref, w2_ref, b2_ref, o_ref):
    # Fused: conv2(h)+BN  +  identity residual x  -> add -> ReLU
    # h_ref: (1, Ho+2, Wo+2, C)   zero-haloed conv1 output
    # x_ref: (1, Ho+2, Wo+2, C)   spatially padded block input (residual = interior)
    _, Ho, Wo, C = o_ref.shape
    p2 = _im2col_3x3(h_ref[0], Ho, Wo, 1)
    y = jnp.dot(p2, w2_ref[...], preferred_element_type=jnp.float32) + b2_ref[...]
    y = y + x_ref[0, 1:Ho + 1, 1:Wo + 1, :].reshape(Ho * Wo, C).astype(jnp.float32)
    y = jnp.maximum(y, 0.0)
    o_ref[0] = y.reshape(Ho, Wo, C).astype(o_ref.dtype)


# ---------------------------------------------------------------------------
# pallas_call wrappers
# ---------------------------------------------------------------------------
def _conv1_bn_relu(xp, w, b, *, stride, Ho, Wo):
    N, Hp, Wp, Cin = xp.shape
    K, Cout = w.shape
    return pl.pallas_call(
        functools.partial(_conv1_kernel, stride=stride),
        grid=(N,),
        in_specs=[
            pl.BlockSpec((1, Hp, Wp, Cin), lambda n: (n, 0, 0, 0)),
            pl.BlockSpec((K, Cout), lambda n: (0, 0)),
            pl.BlockSpec((1, Cout), lambda n: (0, 0)),
        ],
        out_specs=pl.BlockSpec((1, Ho + 2, Wo + 2, Cout), lambda n: (n, 0, 0, 0)),
        out_shape=jax.ShapeDtypeStruct((N, Ho + 2, Wo + 2, Cout), jnp.float32),
        compiler_params=_COMPILER_PARAMS,
    )(xp, w, b)


def _conv2_fused_shortcut(hp, xp, w2, b2, ws, bs, *, stride):
    N, Hop, Wop, C = hp.shape
    Ho, Wo = Hop - 2, Wop - 2
    _, Hp, Wp, Cin = xp.shape
    return pl.pallas_call(
        functools.partial(_conv2_shortcut_kernel, stride=stride),
        grid=(N,),
        in_specs=[
            pl.BlockSpec((1, Hop, Wop, C), lambda n: (n, 0, 0, 0)),
            pl.BlockSpec((1, Hp, Wp, Cin), lambda n: (n, 0, 0, 0)),
            pl.BlockSpec(w2.shape, lambda n: (0, 0)),
            pl.BlockSpec((1, C), lambda n: (0, 0)),
            pl.BlockSpec(ws.shape, lambda n: (0, 0)),
            pl.BlockSpec((1, C), lambda n: (0, 0)),
        ],
        out_specs=pl.BlockSpec((1, Ho, Wo, C), lambda n: (n, 0, 0, 0)),
        out_shape=jax.ShapeDtypeStruct((N, Ho, Wo, C), jnp.float32),
        compiler_params=_COMPILER_PARAMS,
    )(hp, xp, w2, b2, ws, bs)


def _conv2_fused_identity(hp, xp, w2, b2):
    N, Hop, Wop, C = hp.shape
    Ho, Wo = Hop - 2, Wop - 2
    return pl.pallas_call(
        _conv2_identity_kernel,
        grid=(N,),
        in_specs=[
            pl.BlockSpec((1, Hop, Wop, C), lambda n: (n, 0, 0, 0)),
            pl.BlockSpec((1, Hop, Wop, C), lambda n: (n, 0, 0, 0)),
            pl.BlockSpec(w2.shape, lambda n: (0, 0)),
            pl.BlockSpec((1, C), lambda n: (0, 0)),
        ],
        out_specs=pl.BlockSpec((1, Ho, Wo, C), lambda n: (n, 0, 0, 0)),
        out_shape=jax.ShapeDtypeStruct((N, Ho, Wo, C), jnp.float32),
        compiler_params=_COMPILER_PARAMS,
    )(hp, xp, w2, b2)


# ---------------------------------------------------------------------------
# Parameter handling
# ---------------------------------------------------------------------------
def fold_bn(gamma, beta, running_mean, running_var, conv_bias, eps=1e-5):
    """Fold eval-mode BatchNorm (and the preceding conv bias) into scale/bias."""
    scale = gamma / jnp.sqrt(running_var + eps)
    bias = scale * (conv_bias - running_mean) + beta
    return scale, bias


def _prep_conv(p, cin_pad, cout_pad):
    """Fold BN scale into the conv weights, zero-pad channels to lane multiples,
    flatten the 3x3 taps into a single (9*Cin, Cout) contraction."""
    w = p["w"] * p["scale"][None, None, None, :]             # HWIO, scale folded
    _, _, cin, cout = w.shape
    w = jnp.pad(w, ((0, 0), (0, 0), (0, cin_pad - cin), (0, cout_pad - cout)))
    w = w.reshape(9 * cin_pad, cout_pad).astype(jnp.float32)
    b = jnp.pad(p["bias"], (0, cout_pad - cout)).reshape(1, cout_pad)
    return w, b.astype(jnp.float32)


def init_conv_bn_params(key, in_c, out_c):
    """Deterministic synthetic Conv2d(3x3, bias=True) + BatchNorm2d params."""
    k = jax.random.split(key, 6)
    w_oihw = jax.random.normal(k[0], (out_c, in_c, 3, 3), jnp.float32) * 0.1
    conv_bias = jax.random.normal(k[1], (out_c,), jnp.float32) * 0.1
    gamma = jax.random.uniform(k[2], (out_c,), jnp.float32, 0.5, 1.5)
    beta = jax.random.normal(k[3], (out_c,), jnp.float32) * 0.1
    run_mean = jax.random.normal(k[4], (out_c,), jnp.float32) * 0.1
    run_var = jax.random.uniform(k[5], (out_c,), jnp.float32, 0.5, 1.5)
    w_hwio = jnp.transpose(w_oihw, (2, 3, 1, 0))  # OIHW -> HWIO for NHWC conv
    scale, bias = fold_bn(gamma, beta, run_mean, run_var, conv_bias)
    return {"w": w_hwio, "scale": scale, "bias": bias}


def init_resblock_params(key, in_channel, out_channel, stride=1):
    k1, k2, k3 = jax.random.split(key, 3)
    params = {
        "conv1": init_conv_bn_params(k1, in_channel, out_channel),
        "conv2": init_conv_bn_params(k2, out_channel, out_channel),
    }
    if in_channel != out_channel or stride > 1:
        params["shortcut"] = init_conv_bn_params(k3, in_channel, out_channel)
    return params


# ---------------------------------------------------------------------------
# ResBlock forward (NCHW in/out, like PyTorch)
# ---------------------------------------------------------------------------
def res_block_pallas(x_nchw, params, stride=1):
    x = jnp.transpose(x_nchw, (0, 2, 3, 1)).astype(jnp.float32)   # NCHW -> NHWC
    N, H, W, Cin = x.shape
    Cout = params["conv1"]["bias"].shape[0]
    Cin_p, Cout_p = _round_up(Cin, LANE), _round_up(Cout, LANE)
    Ho = (H + 2 - 3) // stride + 1
    Wo = (W + 2 - 3) // stride + 1

    # spatial halo + lane padding done ONCE; reused by conv1 and the shortcut path
    xp = jnp.pad(x, ((0, 0), (1, 1), (1, 1), (0, Cin_p - Cin)))

    w1, b1 = _prep_conv(params["conv1"], Cin_p, Cout_p)
    w2, b2 = _prep_conv(params["conv2"], Cout_p, Cout_p)

    hp = _conv1_bn_relu(xp, w1, b1, stride=stride, Ho=Ho, Wo=Wo)  # zero-haloed output

    if "shortcut" in params:
        ws, bs = _prep_conv(params["shortcut"], Cin_p, Cout_p)
        out = _conv2_fused_shortcut(hp, xp, w2, b2, ws, bs, stride=stride)
    else:
        out = _conv2_fused_identity(hp, xp, w2, b2)

    out = out[..., :Cout]                                  # drop lane padding
    return jnp.transpose(out, (0, 3, 1, 2))                # NHWC -> NCHW

    # TODO(synk): for large images (e.g. 224x224 on v7x's 64 MiB VMEM), add a
    # spatial row-tile grid axis with halo blocks; whole-image blocks are fine at
    # CIFAR-scale shapes this module targets.


# ---------------------------------------------------------------------------
# Pure-JAX reference (correctness sanity check)
# ---------------------------------------------------------------------------
def _conv_bn_ref(x, w, scale, bias, stride, relu=False, residual=None):
    y = lax.conv_general_dilated(
        x, w, window_strides=(stride, stride), padding=((1, 1), (1, 1)),
        dimension_numbers=("NHWC", "HWIO", "NHWC"))
    y = y * scale[None, None, None, :] + bias[None, None, None, :]
    if residual is not None:
        y = y + residual
    if relu or residual is not None:
        y = jnp.maximum(y, 0.0)
    return y


def res_block_ref(x_nchw, params, stride=1):
    x = jnp.transpose(x_nchw, (0, 2, 3, 1))
    p1, p2 = params["conv1"], params["conv2"]
    h = _conv_bn_ref(x, p1["w"], p1["scale"], p1["bias"], stride, relu=True)
    if "shortcut" in params:
        ps = params["shortcut"]
        sc = _conv_bn_ref(x, ps["w"], ps["scale"], ps["bias"], stride)
    else:
        sc = x
    out = _conv_bn_ref(h, p2["w"], p2["scale"], p2["bias"], 1, residual=sc)
    return jnp.transpose(out, (0, 3, 1, 2))


# ---------------------------------------------------------------------------
if __name__ == "__main__":
    key = jax.random.PRNGKey(0)
    kx, kp, kx2, kp2 = jax.random.split(key, 4)

    # Case 1: in_channels != out_channels -> shortcut conv path (fused kernel)
    N, C_IN, C_OUT, HW, STRIDE = 2, 4, 8, 16, 1
    x = jax.random.normal(kx, (N, C_IN, HW, HW), jnp.float32)     # NCHW like PyTorch
    params = init_resblock_params(kp, C_IN, C_OUT, STRIDE)

    out = jax.block_until_ready(res_block_pallas(x, params, stride=STRIDE))
    ref = jax.block_until_ready(res_block_ref(x, params, stride=STRIDE))
    assert out.shape == (N, C_OUT, HW // STRIDE, HW // STRIDE)
    assert jnp.allclose(out, ref, rtol=1e-3, atol=1e-3), "shortcut-conv path mismatch"

    # Case 2: in_channels == out_channels, stride=1 -> identity shortcut path
    x2 = jax.random.normal(kx2, (N, C_OUT, HW, HW), jnp.float32)
    params2 = init_resblock_params(kp2, C_OUT, C_OUT, 1)
    out2 = jax.block_until_ready(res_block_pallas(x2, params2, stride=1))
    ref2 = jax.block_until_ready(res_block_ref(x2, params2, stride=1))
    assert jnp.allclose(out2, ref2, rtol=1e-3, atol=1e-3), "identity path mismatch"

    print("KERNEL_OK")
</pallas_src>

<mosaic_0001>
module attributes {stable_mosaic.version = 11 : i64} {
  func.func @_conv1_kernel(%arg0: i32, %arg1: memref<1x18x18x128xf32, #tpu.memory_space<vmem>>, %arg2: memref<1152x128xf32, #tpu.memory_space<vmem>>, %arg3: memref<1x128xf32, #tpu.memory_space<vmem>>, %arg4: memref<1x18x18x128xf32, #tpu.memory_space<vmem>>) attributes {dimension_semantics = [#tpu.dimension_semantics<parallel>], iteration_bounds = array<i64: 2>, scalar_prefetch = 0 : i64, scratch_operands = 0 : i64, tpu.core_type = #tpu.core_type<tc>, window_params = [{transform_indices = @transform_0, window_bounds = array<i64: 1, 18, 18, 128>}, {pipeline_mode = #tpu.pipeline_mode<synchronous>, transform_indices = @transform_1, window_bounds = array<i64: 1152, 128>}, {pipeline_mode = #tpu.pipeline_mode<synchronous>, transform_indices = @transform_2, window_bounds = array<i64: 1, 128>}, {transform_indices = @transform_3, window_bounds = array<i64: 1, 18, 18, 128>}]} {
    %c0 = arith.constant 0 : index
    %c0_0 = arith.constant 0 : index
    %c0_1 = arith.constant 0 : index
    %c0_2 = arith.constant 0 : index
    %0 = vector.load %arg1[%c0, %c0_0, %c0_1, %c0_2] : memref<1x18x18x128xf32, #tpu.memory_space<vmem>>, vector<1x18x18x128xf32>
    %1 = vector.shape_cast %0 : vector<1x18x18x128xf32> to vector<18x18x128xf32>
    %2 = vector.extract_strided_slice %1 {offsets = [0, 0, 0], sizes = [16, 16, 128], strides = [1, 1, 1]} : vector<18x18x128xf32> to vector<16x16x128xf32>
    %3 = vector.extract_strided_slice %1 {offsets = [0, 1, 0], sizes = [16, 16, 128], strides = [1, 1, 1]} : vector<18x18x128xf32> to vector<16x16x128xf32>
    %4 = vector.extract_strided_slice %1 {offsets = [0, 2, 0], sizes = [16, 16, 128], strides = [1, 1, 1]} : vector<18x18x128xf32> to vector<16x16x128xf32>
    %5 = vector.extract_strided_slice %1 {offsets = [1, 0, 0], sizes = [16, 16, 128], strides = [1, 1, 1]} : vector<18x18x128xf32> to vector<16x16x128xf32>
    %6 = vector.extract_strided_slice %1 {offsets = [1, 1, 0], sizes = [16, 16, 128], strides = [1, 1, 1]} : vector<18x18x128xf32> to vector<16x16x128xf32>
    %7 = vector.extract_strided_slice %1 {offsets = [1, 2, 0], sizes = [16, 16, 128], strides = [1, 1, 1]} : vector<18x18x128xf32> to vector<16x16x128xf32>
    %8 = vector.extract_strided_slice %1 {offsets = [2, 0, 0], sizes = [16, 16, 128], strides = [1, 1, 1]} : vector<18x18x128xf32> to vector<16x16x128xf32>
    %9 = vector.extract_strided_slice %1 {offsets = [2, 1, 0], sizes = [16, 16, 128], strides = [1, 1, 1]} : vector<18x18x128xf32> to vector<16x16x128xf32>
    %10 = vector.extract_strided_slice %1 {offsets = [2, 2, 0], sizes = [16, 16, 128], strides = [1, 1, 1]} : vector<18x18x128xf32> to vector<16x16x128xf32>
    %11 = tpu.concatenate %2, %3, %4, %5, %6, %7, %8, %9, %10 in 2 : vector<16x16x128xf32>, vector<16x16x128xf32>, vector<16x16x128xf32>, vector<16x16x128xf32>, vector<16x16x128xf32>, vector<16x16x128xf32>, vector<16x16x128xf32>, vector<16x16x128xf32>, vector<16x16x128xf32> -> vector<16x16x1152xf32>
    %12 = vector.shape_cast %11 : vector<16x16x1152xf32> to vector<256x1152xf32>
    %c0_3 = arith.constant 0 : index
    %c0_4 = arith.constant 0 : index
    %13 = vector.load %arg2[%c0_3, %c0_4] : memref<1152x128xf32, #tpu.memory_space<vmem>>, vector<1152x128xf32>
    %cst = arith.constant dense<0.000000e+00> : vector<256x128xf32>
    %14 = tpu.matmul %12, %13, %cst {dimension_numbers = #tpu.dot_dimension_numbers<[1], [0], [0], [1], [0, 0, 1, 1], [], []>} : vector<256x1152xf32>, vector<1152x128xf32>, vector<256x128xf32> -> vector<256x128xf32>
    %c0_5 = arith.constant 0 : index
    %c0_6 = arith.constant 0 : index
    %15 = vector.load %arg3[%c0_5, %c0_6] : memref<1x128xf32, #tpu.memory_space<vmem>>, vector<1x128xf32>
    %16 = vector.broadcast %15 : vector<1x128xf32> to vector<256x128xf32>
    %17 = arith.addf %14, %16 : vector<256x128xf32>
    %cst_7 = arith.constant 0.000000e+00 : f32
    %18 = vector.broadcast %cst_7 : f32 to vector<256x128xf32>
    %19 = arith.maximumf %17, %18 : vector<256x128xf32>
    %cst_8 = arith.constant 0.000000e+00 : f32
    %20 = vector.broadcast %cst_8 : f32 to vector<1x18x18x128xf32>
    %c0_9 = arith.constant 0 : index
    %c0_10 = arith.constant 0 : index
    %c0_11 = arith.constant 0 : index
    %c0_12 = arith.constant 0 : index
    %21 = vector.load %arg4[%c0_9, %c0_10, %c0_11, %c0_12] : memref<1x18x18x128xf32, #tpu.memory_space<vmem>>, vector<1x18x18x128xf32>
    tpu.vector_store %arg4[%c0_9, %c0_10, %c0_11, %c0_12], %20 {strides = array<i32>} : memref<1x18x18x128xf32, #tpu.memory_space<vmem>>, vector<1x18x18x128xf32>,
    %22 = vector.shape_cast %19 : vector<256x128xf32> to vector<16x16x128xf32>
    %c0_13 = arith.constant 0 : index
    %c1 = arith.constant 1 : index
    %c1_14 = arith.constant 1 : index
    %c0_15 = arith.constant 0 : index
    %23 = vector.load %arg4[%c0_13, %c1, %c1_14, %c0_15] : memref<1x18x18x128xf32, #tpu.memory_space<vmem>>, vector<1x16x16x128xf32>
    %24 = vector.shape_cast %23 : vector<1x16x16x128xf32> to vector<16x16x128xf32>
    %25 = vector.shape_cast %22 : vector<16x16x128xf32> to vector<1x16x16x128xf32>
    tpu.vector_store %arg4[%c0_13, %c1, %c1_14, %c0_15], %25 {strides = array<i32>} : memref<1x18x18x128xf32, #tpu.memory_space<vmem>>, vector<1x16x16x128xf32>,
    return
  }
  func.func @transform_0(%arg0: i32) -> (i32, i32, i32, i32) {
    %c0_i32 = arith.constant 0 : i32
    %c0_i32_0 = arith.constant 0 : i32
    %c0_i32_1 = arith.constant 0 : i32
    %c0_i32_2 = arith.constant 0 : i32
    return %arg0, %c0_i32, %c0_i32_0, %c0_i32_1 : i32, i32, i32, i32
  }
  func.func @transform_1(%arg0: i32) -> (i32, i32) {
    %c0_i32 = arith.constant 0 : i32
    %c0_i32_0 = arith.constant 0 : i32
    %c0_i32_1 = arith.constant 0 : i32
    return %c0_i32, %c0_i32_0 : i32, i32
  }
  func.func @transform_2(%arg0: i32) -> (i32, i32) {
    %c0_i32 = arith.constant 0 : i32
    %c0_i32_0 = arith.constant 0 : i32
    %c0_i32_1 = arith.constant 0 : i32
    return %c0_i32, %c0_i32_0 : i32, i32
  }
  func.func @transform_3(%arg0: i32) -> (i32, i32, i32, i32) {
    %c0_i32 = arith.constant 0 : i32
    %c0_i32_0 = arith.constant 0 : i32
    %c0_i32_1 = arith.constant 0 : i32
    %c0_i32_2 = arith.constant 0 : i32
    return %arg0, %c0_i32, %c0_i32_0, %c0_i32_1 : i32, i32, i32, i32
  }
}

</mosaic_0001>

<bundles_post_ra>
// kernel: tpu_custom_call.1
= control target key start
LH: loop header
LB: loop body
LE: loop exit
PB: predicated region body
PF: predicated region fallthrough
CT: control target
= control target key end

     0   :  { %s2030_s12 = smov 0   ;;  %s3519_s0 = inlined_call_operand.vmem [shape: f32[2,18,18,128], index: 0, kind: input, shape index: {}]   ;;  %s3520_s1 = inlined_call_operand.vmem [shape: f32[1152,128], index: 1, kind: input, shape index: {}]   ;;  %s3521_s2 = inlined_call_operand.vmem [shape: f32[1,128], index: 2, kind: input, shape index: {}]   ;;  %s3522_s3 = inlined_call_operand.vmem [shape: f32[2,18,18,128], index: 3, kind: output, shape index: {}]  }
   0x1 LB: > { %s1872_s13 = sadd.s32 4294967295, %s2007_s12   ;;  %p1876_p0 = scmp.ge.s32.totalorder %s2007_s12, 1  ;;  %s2007_s12 = sphi %s2030_s12, %s13_s12  }
   0x2   : > { %p137_p1 = scmp.lt.s32.totalorder %s2007_s12, 3 }
   0x4   : > { %p138_p2 = pnand %p1876_p0, %p137_p1 }
   0x6   : > { %141 = sbr.rel (%p138_p2) target bundleno = 752 (0x2f0), region = 32 }
   0xb   : > { %v548_v0 = vld [vmem:[%s3520_s1 + $0x78] sm:$0xff]  ;;  %v547_v1 = vld [vmem:[%s3520_s1 + $0x70] sm:$0xff]  ;;  %v546_v2 = vld [vmem:[%s3520_s1 + $0x68] sm:$0xff]  ;;  %p161_p3 = scmp.lt.s32.totalorder %s1872_s13, 1  ;;  %vm273_vm0 = vcmask 1046528   ;;  %vm386_vm1 = vcmask 1045504  }
   0xc   : > { %1913 = vmatpush.msra.mxu1 %v548_v0  ;;  %1914 = vmatpush.msra.mxu2 %v548_v0  ;;  %v545_v3 = vld [vmem:[%s3520_s1 + $0x60] sm:$0xff]  ;;  %v544_v4 = vld [vmem:[%s3520_s1 + $0x58] sm:$0xff]  ;;  %v543_v5 = vld [vmem:[%s3520_s1 + $0x50] sm:$0xff] }
   0xd   : > { %1915 = vmatpush.msra.mxu3 %v548_v0  ;;  %681 = vmatpush.msra.mxu0 %v548_v0  ;;  %v542_v6 = vld [vmem:[%s3520_s1 + $0x48] sm:$0xff]  ;;  %v541_v7 = vld [vmem:[%s3520_s1 + $0x40] sm:$0xff]  ;;  %v540_v8 = vld [vmem:[%s3520_s1 + $0x38] sm:$0xff]  ;;  %s3672_s13 = smov (!%p161_p3, %s1872_s13), 1 }
   0xe   : > { %1916 = vmatpush.msra.mxu1 %v547_v1  ;;  %1917 = vmatpush.msra.mxu2 %v547_v1  ;;  %v539_v9 = vld [vmem:[%s3520_s1 + $0x30] sm:$0xff]  ;;  %v538_v10 = vld [vmem:[%s3520_s1 + $0x28] sm:$0xff]  ;;  %v537_v11 = vld [vmem:[%s3520_s1 + $0x20] sm:$0xff]  ;;  %s1961_s15 = smul.u32 432, %s3672_s13 }
   0xf   : > { %1918 = vmatpush.msra.mxu3 %v547_v1  ;;  %682 = vmatpush.msra.mxu0 %v547_v1  ;;  %v536_v12 = vld [vmem:[%s3520_s1 + $0x18] sm:$0xff]  ;;  %v535_v13 = vld [vmem:[%s3520_s1 + $0x10] sm:$0xff]  ;;  %v534_v14 = vld [vmem:[%s3520_s1 + $0x8] sm:$0xff] }
  0x10   : > { %1919 = vmatpush.msra.mxu1 %v546_v2  ;;  %1920 = vmatpush.msra.mxu2 %v546_v2  ;;  %s2095_s22 = scalar_lea.vmem %s3519_s0, %s1961_s15  ;;  %v533_v15 = vld [vmem:[%s3520_s1] sm:$0xff]  ;;  %v580_v18 = vld [vmem:[%s3520_s1 + $0x178] sm:$0xff]  ;;  %v579_v22 = vld [vmem:[%s3520_s1 + $0x170] sm:$0xff]  ;;  %s3253_s5 = scalar_lea.vmem %s3522_s3, %s1961_s15 }
  0x11   : > { %1921 = vmatpush.msra.mxu3 %v546_v2  ;;  %683 = vmatpush.msra.mxu0 %v546_v2  ;;  %v2101_v16 = vld [vmem:[%s2095_s22 + $0x60] sm:$0xff]  ;;  %v564_v20 = vld [vmem:[%s3520_s1 + $0xf8] sm:$0xff]  ;;  %v563_v23 = vld [vmem:[%s3520_s1 + $0xf0] sm:$0xff] }
  0x12   : > { %1922 = vmatpush.msra.mxu1 %v545_v3  ;;  %1923 = vmatpush.msra.mxu2 %v545_v3  ;;  %v2104_v17 = vld [vmem:[%s2095_s22 + $0xc0] sm:$0xff]  ;;  %v596_v21 = vld [vmem:[%s3520_s1 + $0x1f8] sm:$0xff]  ;;  %v595_v24 = vld [vmem:[%s3520_s1 + $0x1f0] sm:$0xff] }
  0x13   : > { %1924 = vmatpush.msra.mxu3 %v545_v3  ;;  %684 = vmatpush.msra.mxu0 %v545_v3  ;;  %v207_v19 = vld [vmem:[%s2095_s22 + $0x120] sm:$0xff]  ;;  %v578_v25 = vld [vmem:[%s3520_s1 + $0x168] sm:$0xff]  ;;  %v612_v29 = vld [vmem:[%s3520_s1 + $0x278] sm:$0xff] }
  0x14   : > { %1925 = vmatpush.msra.mxu1 %v544_v4  ;;  %1926 = vmatpush.msra.mxu2 %v544_v4  ;;  %v2131_v26 = vld [vmem:[%s2095_s22] sm:$0xff]  ;;  %v562_v27 = vld [vmem:[%s3520_s1 + $0xe8] sm:$0xff]  ;;  %v611_v35 = vld [vmem:[%s3520_s1 + $0x270] sm:$0xff] }
  0x15   : > { %1927 = vmatpush.msra.mxu3 %v544_v4  ;;  %685 = vmatpush.msra.mxu0 %v544_v4  ;;  %v594_v28 = vld [vmem:[%s3520_s1 + $0x1e8] sm:$0xff]  ;;  %v577_v32 = vld [vmem:[%s3520_s1 + $0x160] sm:$0xff]  ;;  %v576_v37 = vld [vmem:[%s3520_s1 + $0x158] sm:$0xff] }
  0x16   : > { %1928 = vmatpush.msra.mxu1 %v543_v5  ;;  %1929 = vmatpush.msra.mxu2 %v543_v5  ;;  %v2143_v30 = vld [vmem:[%s2095_s22 + $0x68] sm:$0xff]  ;;  %v593_v33 = vld [vmem:[%s3520_s1 + $0x1e0] sm:$0xff]  ;;  %v592_v38 = vld [vmem:[%s3520_s1 + $0x1d8] sm:$0xff] }
  0x17   : > { %1930 = vmatpush.msra.mxu3 %v543_v5  ;;  %686 = vmatpush.msra.mxu0 %v543_v5  ;;  %v2146_v31 = vld [vmem:[%s2095_s22 + $0xc8] sm:$0xff]  ;;  %v561_v36 = vld [vmem:[%s3520_s1 + $0xe0] sm:$0xff]  ;;  %v560_v40 = vld [vmem:[%s3520_s1 + $0xd8] sm:$0xff] }
  0x18   : > { %1931 = vmatpush.msra.mxu1 %v542_v6  ;;  %1932 = vmatpush.msra.mxu2 %v542_v6  ;;  %v208_v34 = vld [vmem:[%s2095_s22 + $0x128] sm:$0xff]  ;;  %v575_v41 = vld [vmem:[%s3520_s1 + $0x150] sm:$0xff]  ;;  %v609_v44 = vld [vmem:[%s3520_s1 + $0x260] sm:$0xff] }
  0x19   : > { %1933 = vmatpush.msra.mxu3 %v542_v6  ;;  %687 = vmatpush.msra.mxu0 %v542_v6  ;;  %v610_v39 = vld [vmem:[%s3520_s1 + $0x268] sm:$0xff]  ;;  %v591_v43 = vld [vmem:[%s3520_s1 + $0x1d0] sm:$0xff]  ;;  %v2192_v46 = vld [vmem:[%s2095_s22 + $0x78] sm:$0xff] }
  0x1a   : > { %1934 = vmatpush.msra.mxu1 %v541_v7  ;;  %1935 = vmatpush.msra.mxu2 %v541_v7  ;;  %v2180_v42 = vld [vmem:[%s2095_s22 + $0x8] sm:$0xff]  ;;  %v559_v45 = vld [vmem:[%s3520_s1 + $0xd0] sm:$0xff]  ;;  %v2195_v47 = vld [vmem:[%s2095_s22 + $0xd8] sm:$0xff] }
  0x1b   : > { %1936 = vmatpush.msra.mxu3 %v541_v7  ;;  %688 = vmatpush.msra.mxu0 %v541_v7  ;;  %v574_v48 = vld [vmem:[%s3520_s1 + $0x148] sm:$0xff]  ;;  %v210_v50 = vld [vmem:[%s2095_s22 + $0x138] sm:$0xff]  ;;  %v573_v53 = vld [vmem:[%s3520_s1 + $0x140] sm:$0xff] }
  0x1c   : > { %1937 = vmatpush.msra.mxu1 %v540_v8  ;;  %1938 = vmatpush.msra.mxu2 %v540_v8  ;;  %v590_v49 = vld [vmem:[%s3520_s1 + $0x1c8] sm:$0xff]  ;;  %v608_v51 = vld [vmem:[%s3520_s1 + $0x258] sm:$0xff]  ;;  %v589_v54 = vld [vmem:[%s3520_s1 + $0x1c0] sm:$0xff] }
  0x1d   : > { %1939 = vmatpush.msra.mxu3 %v540_v8  ;;  %689 = vmatpush.msra.mxu0 %v540_v8  ;;  %v558_v52 = vld [vmem:[%s3520_s1 + $0xc8] sm:$0xff]  ;;  %v607_v55 = vld [vmem:[%s3520_s1 + $0x250] sm:$0xff]  ;;  %v557_v56 = vld [vmem:[%s3520_s1 + $0xc0] sm:$0xff] }
  0x1e   : > { %1940 = vmatpush.msra.mxu1 %v539_v9  ;;  %1941 = vmatpush.msra.mxu2 %v539_v9  ;;  %v572_v57 = vld [vmem:[%s3520_s1 + $0x138] sm:$0xff]  ;;  %v606_v60 = vld [vmem:[%s3520_s1 + $0x248] sm:$0xff]  ;;  %v2241_v62 = vld [vmem:[%s2095_s22 + $0x80] sm:$0xff] }
  0x1f   : > { %1942 = vmatpush.msra.mxu3 %v539_v9  ;;  %690 = vmatpush.msra.mxu0 %v539_v9  ;;  %v2229_v58 = vld [vmem:[%s2095_s22 + $0x18] sm:$0xff]  ;;  %v2244_v63 = vld [vmem:[%s2095_s22 + $0xe0] sm:$0xff]  ;;  %v571_v0 = vld [vmem:[%s3520_s1 + $0x130] sm:$0xff] }
  0x20   : > { %1943 = vmatpush.msra.mxu1 %v538_v10  ;;  %1944 = vmatpush.msra.mxu2 %v538_v10  ;;  %v588_v59 = vld [vmem:[%s3520_s1 + $0x1b8] sm:$0xff]  ;;  %v587_v1 = vld [vmem:[%s3520_s1 + $0x1b0] sm:$0xff]  ;;  %v211_v2 = vld [vmem:[%s2095_s22 + $0x140] sm:$0xff] }
  0x21   : > { %1945 = vmatpush.msra.mxu3 %v538_v10  ;;  %691 = vmatpush.msra.mxu0 %v538_v10  ;;  %v556_v61 = vld [vmem:[%s3520_s1 + $0xb8] sm:$0xff]  ;;  %v605_v3 = vld [vmem:[%s3520_s1 + $0x240] sm:$0xff]  ;;  %v555_v4 = vld [vmem:[%s3520_s1 + $0xb0] sm:$0xff] }
  0x22   : > { %1946 = vmatpush.msra.mxu1 %v537_v11  ;;  %1947 = vmatpush.msra.mxu2 %v537_v11  ;;  %v570_v5 = vld [vmem:[%s3520_s1 + $0x128] sm:$0xff]  ;;  %v604_v7 = vld [vmem:[%s3520_s1 + $0x238] sm:$0xff]  ;;  %v569_v9 = vld [vmem:[%s3520_s1 + $0x120] sm:$0xff] }
  0x23   : > { %1948 = vmatpush.msra.mxu3 %v537_v11  ;;  %692 = vmatpush.msra.mxu0 %v537_v11  ;;  %v586_v6 = vld [vmem:[%s3520_s1 + $0x1a8] sm:$0xff]  ;;  %v2278_v10 = vld [vmem:[%s2095_s22 + $0x20] sm:$0xff] }
  0x24   : > { %1949 = vmatpush.msra.mxu1 %v536_v12  ;;  %1950 = vmatpush.msra.mxu2 %v536_v12  ;;  %v554_v8 = vld [vmem:[%s3520_s1 + $0xa8] sm:$0xff]  ;;  %v585_v11 = vld [vmem:[%s3520_s1 + $0x1a0] sm:$0xff] }
  0x25   : > { %1951 = vmatpush.msra.mxu3 %v536_v12  ;;  %693 = vmatpush.msra.mxu0 %v536_v12  ;;  %v603_v12 = vld [vmem:[%s3520_s1 + $0x230] sm:$0xff] }
  0x26   : > { %1952 = vmatpush.msra.mxu1 %v535_v13  ;;  %1953 = vmatpush.msra.mxu2 %v535_v13 }
  0x27   : > { %1954 = vmatpush.msra.mxu3 %v535_v13  ;;  %694 = vmatpush.msra.mxu0 %v535_v13  ;;  %v553_v13 = vld [vmem:[%s3520_s1 + $0xa0] sm:$0xff] }
  0x28   : > { %1955 = vmatpush.msra.mxu1 %v534_v14  ;;  %1956 = vmatpush.msra.mxu2 %v534_v14 }
  0x29   : > { %1957 = vmatpush.msra.mxu3 %v534_v14  ;;  %695 = vmatpush.msra.mxu0 %v534_v14  ;;  %v2290_v14 = vld [vmem:[%s2095_s22 + $0x90] sm:$0xff] }
  0x2a   : > { %1958 = vmatpush.msra.mxu1 %v533_v15  ;;  %1959 = vmatpush.msra.mxu2 %v533_v15 }
  0x2b   : > { %721 = vmatmul.f32.vlgmr.msra.gmra.mxu1 %v2101_v16  ;;  %745 = vmatmul.f32.vlgmr.msra.gmra.mxu2 %v2104_v17 }
  0x2c   : > { %907 = vmatpush.msrb.mxu2 %v580_v18  ;;  %1960 = vmatpush.msra.mxu3 %v533_v15  ;;  %v568_v18 = vld [vmem:[%s3520_s1 + $0x118] sm:$0xff] }
  0x2d   : > { %769 = vmatmul.f32.vlgmr.msra.gmra.mxu3 %v207_v19  ;;  %794 = vmatpush.msrb.mxu1 %v564_v20  ;;  %v584_v19 = vld [vmem:[%s3520_s1 + $0x198] sm:$0xff]  ;;  %v213_v20 = vld [vmem:[%s2095_s22 + $0x150] sm:$0xff] }
  0x2e   : > { %1020 = vmatpush.msrb.mxu3 %v596_v21  ;;  %908 = vmatpush.msrb.mxu2 %v579_v22  ;;  %v602_v21 = vld [vmem:[%s3520_s1 + $0x228] sm:$0xff]  ;;  %v552_v22 = vld [vmem:[%s3520_s1 + $0x98] sm:$0xff] }
  0x2f   : > { %795 = vmatpush.msrb.mxu1 %v563_v23  ;;  %696 = vmatpush.msra.mxu0 %v533_v15  ;;  %v2293_v15 = vld [vmem:[%s2095_s22 + $0xf0] sm:$0xff] }
  0x30   : > { %1021 = vmatpush.msrb.mxu3 %v595_v24  ;;  %909 = vmatpush.msrb.mxu2 %v578_v25  ;;  %v567_v23 = vld [vmem:[%s3520_s1 + $0x110] sm:$0xff]  ;;  %v601_v25 = vld [vmem:[%s3520_s1 + $0x220] sm:$0xff] }
  0x31   : > { %697 = vmatmul.f32.vlgmr.msra.gmra.mxu0 %v2131_v26  ;;  %796 = vmatpush.msrb.mxu1 %v562_v27  ;;  %v583_v24 = vld [vmem:[%s3520_s1 + $0x190] sm:$0xff] }
  0x32   : > { %1022 = vmatpush.msrb.mxu3 %v594_v28  ;;  %1133 = vmatpush.msrb.mxu0 %v612_v29  ;;  %v551_v27 = vld [vmem:[%s3520_s1 + $0x90] sm:$0xff]  ;;  %v566_v28 = vld [vmem:[%s3520_s1 + $0x108] sm:$0xff] }
  0x33   : > { %724 = vmatmul.f32.gmra.mxu1 %v2143_v30  ;;  %748 = vmatmul.f32.gmra.mxu2 %v2146_v31  ;;  %v2327_v29 = vld [vmem:[%s2095_s22 + $0x30] sm:$0xff] }
  0x34   : > { %910 = vmatpush.msrb.mxu2 %v577_v32  ;;  %1023 = vmatpush.msrb.mxu3 %v593_v33  ;;  %v582_v32 = vld [vmem:[%s3520_s1 + $0x188] sm:$0xff]  ;;  %v600_v33 = vld [vmem:[%s3520_s1 + $0x218] sm:$0xff] }
  0x35   : > { %772 = vmatmul.f32.gmra.mxu3 %v208_v34  ;;  %1134 = vmatpush.msrb.mxu0 %v611_v35  ;;  %v550_v34 = vld [vmem:[%s3520_s1 + $0x88] sm:$0xff]  ;;  %v2339_v35 = vld [vmem:[%s2095_s22 + $0x98] sm:$0xff] }
  0x36   : > { %797 = vmatpush.msrb.mxu1 %v561_v36  ;;  %911 = vmatpush.msrb.mxu2 %v576_v37  ;;  %v2342_v36 = vld [vmem:[%s2095_s22 + $0xf8] sm:$0xff]  ;;  %v565_v37 = vld [vmem:[%s3520_s1 + $0x100] sm:$0xff] }
  0x37   : > { %1024 = vmatpush.msrb.mxu3 %v592_v38  ;;  %1135 = vmatpush.msrb.mxu0 %v610_v39  ;;  %v581_v38 = vld [vmem:[%s3520_s1 + $0x180] sm:$0xff]  ;;  %v214_v39 = vld [vmem:[%s2095_s22 + $0x158] sm:$0xff] }
  0x38   : > { %798 = vmatpush.msrb.mxu1 %v560_v40  ;;  %912 = vmatpush.msrb.mxu2 %v575_v41  ;;  %v599_v40 = vld [vmem:[%s3520_s1 + $0x210] sm:$0xff]  ;;  %v549_v41 = vld [vmem:[%s3520_s1 + $0x80] sm:$0xff] }
  0x39   : > { %700 = vmatmul.f32.gmra.mxu0 %v2180_v42  ;;  %1025 = vmatpush.msrb.mxu3 %v591_v43  ;;  %v644_v43 = vld [vmem:[%s3520_s1 + $0x378] sm:$0xff] }
  0x3a   : > { %1136 = vmatpush.msrb.mxu0 %v609_v44  ;;  %799 = vmatpush.msrb.mxu1 %v559_v45  ;;  %v598_v44 = vld [vmem:[%s3520_s1 + $0x208] sm:$0xff]  ;;  %v660_v45 = vld [vmem:[%s3520_s1 + $0x3f8] sm:$0xff] }
  0x3b   : > { %727 = vmatmul.f32.gmra.mxu1 %v2192_v46  ;;  %751 = vmatmul.f32.gmra.mxu2 %v2195_v47 }
  0x3c   : > { %913 = vmatpush.msrb.mxu2 %v574_v48  ;;  %1026 = vmatpush.msrb.mxu3 %v590_v49  ;;  %v628_v48 = vld [vmem:[%s3520_s1 + $0x2f8] sm:$0xff] }
  0x3d   : > { %775 = vmatmul.f32.gmra.mxu3 %v210_v50  ;;  %1137 = vmatpush.msrb.mxu0 %v608_v51  ;;  %v2373_v49 = vld [vmem:[%s2095_s22 + $0x38] sm:$0xff]  ;;  %v597_v50 = vld [vmem:[%s3520_s1 + $0x200] sm:$0xff]  ;;  %v2379_v51 = vld [vmem:[%s2095_s22 + $0xa8] sm:$0xff] }
  0x3e   : > { %800 = vmatpush.msrb.mxu1 %v558_v52  ;;  %914 = vmatpush.msrb.mxu2 %v573_v53  ;;  %v2382_v52 = vld [vmem:[%s2095_s22 + $0x108] sm:$0xff]  ;;  %v676_v53 = vld [vmem:[%s3520_s1 + $0x478] sm:$0xff] }
  0x3f   : > { %1027 = vmatpush.msrb.mxu3 %v589_v54  ;;  %1138 = vmatpush.msrb.mxu0 %v607_v55  ;;  %v216_v54 = vld [vmem:[%s2095_s22 + $0x168] sm:$0xff]  ;;  %v643_v55 = vld [vmem:[%s3520_s1 + $0x370] sm:$0xff] }
  0x40   : > { %801 = vmatpush.msrb.mxu1 %v557_v56  ;;  %915 = vmatpush.msrb.mxu2 %v572_v57  ;;  %v659_v56 = vld [vmem:[%s3520_s1 + $0x3f0] sm:$0xff] }
  0x41   : > { %703 = vmatmul.f32.gmra.mxu0 %v2229_v58  ;;  %1028 = vmatpush.msrb.mxu3 %v588_v59  ;;  %v627_v57 = vld [vmem:[%s3520_s1 + $0x2f0] sm:$0xff]  ;;  %v2401_v59 = vld [vmem:[%s2095_s22 + $0x48] sm:$0xff] }
  0x42   : > { %1139 = vmatpush.msrb.mxu0 %v606_v60  ;;  %802 = vmatpush.msrb.mxu1 %v556_v61  ;;  %v2404_v60 = vld [vmem:[%s2095_s22 + $0xb0] sm:$0xff] }
  0x43   : > { %730 = vmatmul.f32.gmra.mxu1 %v2241_v62  ;;  %754 = vmatmul.f32.gmra.mxu2 %v2244_v63  ;;  %v2407_v61 = vld [vmem:[%s2095_s22 + $0x110] sm:$0xff] }
  0x44   : > { %916 = vmatpush.msrb.mxu2 %v571_v0  ;;  %1029 = vmatpush.msrb.mxu3 %v587_v1  ;;  %v217_v0 = vld [vmem:[%s2095_s22 + $0x170] sm:$0xff]  ;;  %v274_v1 = vrot.slane %v2131_v26, 1 }
  0x45   : > { %778 = vmatmul.f32.gmra.mxu3 %v211_v2  ;;  %1140 = vmatpush.msrb.mxu0 %v605_v3  ;;  %v387_v2 = vrot.slane %v2131_v26, 2  ;;  %v275_v3 = vrot.slane %v2180_v42, 1  ;;  %v173_v26 = vld [vmem:[%s2095_s22 + $0x10] sm:$0x3] }
  0x46   : > { %803 = vmatpush.msrb.mxu1 %v555_v4  ;;  %917 = vmatpush.msrb.mxu2 %v570_v5  ;;  %v388_v4 = vrot.slane %v2180_v42, 2  ;;  %v675_v5 = vld [vmem:[%s3520_s1 + $0x470] sm:$0xff]  ;;  %v279_v42 = vrot.slane %v2229_v58, 1 }
  0x47   : > { %1030 = vmatpush.msrb.mxu3 %v586_v6  ;;  %1141 = vmatpush.msrb.mxu0 %v604_v7  ;;  %v2421_v6 = vld [vmem:[%s2095_s22 + $0x50] sm:$0xff]  ;;  %v276_v7 = vsel %vm273_vm0, %v274_v1, %v275_v3  ;;  %v182_v1 = vld [vmem:[%s2095_s22 + $0x58] sm:$0x3] }
  0x48   : > { %804 = vmatpush.msrb.mxu1 %v554_v8  ;;  %918 = vmatpush.msrb.mxu2 %v569_v9  ;;  %v389_v8 = vsel %vm386_vm1, %v387_v2, %v388_v4  ;;  %v280_v9 = vrot.slane %v2278_v10, 1  ;;  %v624_v2 = vld [vmem:[%s3520_s1 + $0x2d8] sm:$0xff] }
  0x49   : > { %706 = vmatmul.f32.gmra.mxu0 %v2278_v10  ;;  %1031 = vmatpush.msrb.mxu3 %v585_v11  ;;  %v642_v11 = vld [vmem:[%s3520_s1 + $0x368] sm:$0xff] }
  0x4a   : > { %1142 = vmatpush.msrb.mxu0 %v603_v12  ;;  %805 = vmatpush.msrb.mxu1 %v553_v13  ;;  %v277_v12 = vrot.slane %v173_v26, 1  ;;  %v390_v13 = vrot.slane %v173_v26, 2 }
  0x4b   : > { %733 = vmatmul.f32.gmra.mxu1 %v2290_v14  ;;  %757 = vmatmul.f32.gmra.mxu2 %v2293_v15 }
  0x4c   : > { %919 = vmatpush.msrb.mxu2 %v568_v18  ;;  %1032 = vmatpush.msrb.mxu3 %v584_v19  ;;  %v658_v18 = vld [vmem:[%s3520_s1 + $0x3e8] sm:$0xff] }
  0x4d   : > { %781 = vmatmul.f32.gmra.mxu3 %v213_v20  ;;  %1143 = vmatpush.msrb.mxu0 %v602_v21  ;;  %v626_v19 = vld [vmem:[%s3520_s1 + $0x2e8] sm:$0xff]  ;;  %v281_v20 = vsel %vm273_vm0, %v279_v42, %v280_v9 }
  0x4e   : > { %806 = vmatpush.msrb.mxu1 %v552_v22  ;;  %920 = vmatpush.msrb.mxu2 %v567_v23  ;;  %v176_v21 = vld [vmem:[%s2095_s22 + $0x28] sm:$0x3]  ;;  %v278_v22 = vsel %vm273_vm0, %v275_v3, %v277_v12  ;;  %v391_v23 = vsel %vm386_vm1, %v388_v4, %v390_v13  ;;  %v292_v4 = vrot.slane %v182_v1, 1  ;;  %v655_v12 = vld [vmem:[%s3520_s1 + $0x3d0] sm:$0xff] }
  0x4f   : > { %1033 = vmatpush.msrb.mxu3 %v583_v24  ;;  %1144 = vmatpush.msrb.mxu0 %v601_v25  ;;  %v282_v24 = vrot.slane %v176_v21, 1  ;;  %v392_v25 = vrot.slane %v2229_v58, 2 }
  0x50   : > { %807 = vmatpush.msrb.mxu1 %v551_v27  ;;  %921 = vmatpush.msrb.mxu2 %v566_v28  ;;  %v393_v27 = vrot.slane %v2278_v10, 2  ;;  %v674_v28 = vld [vmem:[%s3520_s1 + $0x468] sm:$0xff] }
  0x51   : > { %709 = vmatmul.f32.gmra.mxu0 %v2327_v29  ;;  %1034 = vmatpush.msrb.mxu3 %v582_v32  ;;  %v283_v32 = vsel %vm273_vm0, %v280_v9, %v282_v24  ;;  %v295_v9 = vrot.slane %v2143_v30, 1  ;;  %v671_v24 = vld [vmem:[%s3520_s1 + $0x450] sm:$0xff] }
  0x52   : > { %1145 = vmatpush.msrb.mxu0 %v600_v33  ;;  %808 = vmatpush.msrb.mxu1 %v550_v34  ;;  %v2451_v33 = vsel %vm386_vm1, %v392_v25, %v393_v27  ;;  %v284_v34 = vrot.slane %v2327_v29, 1 }
  0x53   : > { %736 = vmatmul.f32.gmra.mxu1 %v2339_v35  ;;  %760 = vmatmul.f32.gmra.mxu2 %v2342_v36 }
  0x54   : > { %922 = vmatpush.msrb.mxu2 %v565_v37  ;;  %1035 = vmatpush.msrb.mxu3 %v581_v38  ;;  %v395_v37 = vrot.slane %v176_v21, 2  ;;  %v657_v38 = vld [vmem:[%s3520_s1 + $0x3e0] sm:$0xff] }
  0x55   : > { %784 = vmatmul.f32.gmra.mxu3 %v214_v39  ;;  %1146 = vmatpush.msrb.mxu0 %v599_v40  ;;  %v625_v39 = vld [vmem:[%s3520_s1 + $0x2e0] sm:$0xff] }
  0x56   : > { %809 = vmatpush.msrb.mxu1 %v549_v41  ;;  %1359 = vmatpush.msra.mxu2 %v644_v43  ;;  %v179_v41 = vld [vmem:[%s2095_s22 + $0x40] sm:$0x3]  ;;  %v2471_v43 = vsel %vm386_vm1, %v393_v27, %v395_v37 }
  0x57   : > { %1147 = vmatpush.msrb.mxu0 %v598_v44  ;;  %1472 = vmatpush.msra.mxu3 %v660_v45  ;;  %v287_v44 = vrot.slane %v179_v41, 1  ;;  %v397_v45 = vrot.slane %v2327_v29, 2 }
  0x58   : > { %1246 = vmatpush.msra.mxu1 %v628_v48  ;;  %1360 = vmatpush.msra.mxu2 %v643_v55  ;;  %v398_v48 = vrot.slane %v2373_v49, 2  ;;  %v290_v55 = vrot.slane %v2421_v6, 1 }
  0x59   : > { %712 = vmatmul.f32.gmra.mxu0 %v2373_v49  ;;  %1473 = vmatpush.msra.mxu3 %v659_v56  ;;  %v400_v56 = vrot.slane %v179_v41, 2 }
  0x5a   : > { %1148 = vmatpush.msrb.mxu0 %v597_v50  ;;  %1247 = vmatpush.msra.mxu1 %v627_v57  ;;  %v673_v50 = vld [vmem:[%s3520_s1 + $0x460] sm:$0xff]  ;;  %v656_v57 = vld [vmem:[%s3520_s1 + $0x3d8] sm:$0xff]  ;;  %v2519_v26 = vsel %vm273_vm0, %v290_v55, %v292_v4 }
  0x5b   : > { %739 = vmatmul.f32.gmra.mxu1 %v2379_v51  ;;  %763 = vmatmul.f32.gmra.mxu2 %v2382_v52  ;;  %v2507_v3 = vsel %vm386_vm1, %v398_v48, %v400_v56  ;;  %v412_v56 = vrot.slane %v2192_v46, 2 }
  0x5c   : > { %1585 = vmatpush.msra.mxu0 %v676_v53  ;;  %1361 = vmatpush.msra.mxu2 %v642_v11  ;;  %v405_v11 = vrot.slane %v182_v1, 2  ;;  %v670_v1 = vld [vmem:[%s3520_s1 + $0x448] sm:$0xff] }
  0x5d   : > { %787 = vmatmul.f32.gmra.mxu3 %v216_v54  ;;  %1248 = vmatpush.msra.mxu1 %v626_v19  ;;  %v2485_v54 = vsel %vm386_vm1, %v397_v45, %v398_v48  ;;  %v623_v19 = vld [vmem:[%s3520_s1 + $0x2d0] sm:$0xff]  ;;  %v622_v45 = vld [vmem:[%s3520_s1 + $0x2c8] sm:$0xff] }
  0x5e   : > { %1586 = vmatpush.msra.mxu0 %v675_v5  ;;  %1474 = vmatpush.msra.mxu3 %v658_v18  ;;  %v402_v5 = vrot.slane %v2401_v59, 2  ;;  %v185_v18 = vld [vmem:[%s2095_s22 + $0x70] sm:$0x3] }
  0x5f   : > { %1249 = vmatpush.msra.mxu1 %v625_v39  ;;  %v297_v21 = vrot.slane %v185_v18, 1 }
  0x60   : > { %1587 = vmatpush.msra.mxu0 %v674_v28  ;;  %1475 = vmatpush.msra.mxu3 %v657_v38 }
  0x61   : > { %715 = vmatmul.f32.gmra.mxu0 %v2401_v59  ;;  %1250 = vmatpush.msra.mxu1 %v624_v2  ;;  %v2556_v25 = vsel %vm273_vm0, %v295_v9, %v297_v21 }
  0x62   : > { %1588 = vmatpush.msra.mxu0 %v673_v50  ;;  %1476 = vmatpush.msra.mxu3 %v656_v57  ;;  %v413_v57 = vrot.slane %v2241_v62, 2 }
  0x63   : > { %742 = vmatmul.f32.gmra.mxu1 %v2404_v60  ;;  %766 = vmatmul.f32.gmra.mxu2 %v2407_v61 }
  0x64   : > { %1477 = vmatpush.msra.mxu3 %v655_v12  ;;  %1251 = vmatpush.msra.mxu1 %v623_v19 }
  0x65   : > { %790 = vmatmul.f32.gmra.mxu3 %v217_v0 }
  0x66   : > { %1252 = vmatpush.msra.mxu1 %v622_v45  ;;  %v418_v45 = vrot.slane %v2339_v35, 2 }
  0x69   : > { %718 = vmatmul.f32.gmra.mxu0 %v2421_v6 }
  0x6b   : > { %810 = vmatmul.f32.vlgmr.msrb.gmra.mxu1 %v276_v7  ;;  %923 = vmatmul.f32.vlgmr.msrb.gmra.mxu2 %v389_v8  ;;  %v403_v7 = vrot.slane %v2421_v6, 2  ;;  %v672_v8 = vld [vmem:[%s3520_s1 + $0x458] sm:$0xff] }
  0x6c   : > { %1589 = vmatpush.msra.mxu0 %v672_v8 }
  0x6d   : > { %1036 = vmatmul.f32.vlgmr.msrb.gmra.mxu3 %v2229_v58  ;;  %v285_v58 = vrot.slane %v2373_v49, 1  ;;  %v2522_v42 = vsel %vm386_vm1, %v402_v5, %v403_v7 }
  0x6e   : > { %1590 = vmatpush.msra.mxu0 %v671_v24  ;;  %v191_v24 = vld [vmem:[%s2095_s22 + $0xa0] sm:$0x3] }
  0x6f   : > { %v2467_v40 = vsel %vm273_vm0, %v284_v34, %v285_v58  ;;  %v2482_v53 = vsel %vm273_vm0, %v285_v58, %v287_v44  ;;  %v410_v34 = vrot.slane %v185_v18, 2  ;;  %v2574_v58 = vld [vmem:[%s3521_s2] ss:$0 sm:$0xff]  ;;  %v188_v44 = vld [vmem:[%s2095_s22 + $0x88] sm:$0x3] }
  0x70   : > { %1591 = vmatpush.msra.mxu0 %v670_v1  ;;  %v415_v12 = vrot.slane %v188_v44, 2  ;;  %v653_v18 = vld [vmem:[%s3520_s1 + $0x3c0] sm:$0xff] }
  0x71   : > { %1149 = vmatmul.f32.vlgmr.msrb.gmra.mxu0 %v281_v20 }
  0x73   : > { %813 = vmatmul.f32.gmra.mxu1 %v278_v22  ;;  %926 = vmatmul.f32.gmra.mxu2 %v391_v23  ;;  %v407_v22 = vrot.slane %v2101_v16, 2  ;;  %v408_v23 = vrot.slane %v2143_v30, 2 }
  0x75   : > { %1039 = vmatmul.f32.gmra.mxu3 %v2278_v10  ;;  %v641_v10 = vld [vmem:[%s3520_s1 + $0x360] sm:$0xff]  ;;  %v2561_v28 = vsel %vm386_vm1, %v407_v22, %v408_v23 }
  0x76   : > { %1362 = vmatpush.msra.mxu2 %v641_v10  ;;  %v654_v10 = vld [vmem:[%s3520_s1 + $0x3c8] sm:$0xff] }
  0x77   : > { %1478 = vmatpush.msra.mxu3 %v654_v10 }
  0x79   : > { %1152 = vmatmul.f32.gmra.mxu0 %v283_v32  ;;  %1479 = vmatpush.msra.mxu3 %v653_v18  ;;  %v652_v18 = vld [vmem:[%s3520_s1 + $0x3b8] sm:$0xff] }
  0x7b   : > { %816 = vmatmul.f32.gmra.mxu1 %v281_v20  ;;  %929 = vmatmul.f32.gmra.mxu2 %v2451_v33  ;;  %v2544_v20 = vsel %vm386_vm1, %v403_v7, %v405_v11  ;;  %v637_v11 = vld [vmem:[%s3520_s1 + $0x340] sm:$0xff] }
  0x7c   : > { %1480 = vmatpush.msra.mxu3 %v652_v18  ;;  %v422_v18 = vrot.slane %v2379_v51, 2 }
  0x7d   : > { %1042 = vmatmul.f32.gmra.mxu3 %v2327_v29  ;;  %v289_v29 = vrot.slane %v2401_v59, 1 }
  0x7f   : > { %v2500_v0 = vsel %vm273_vm0, %v289_v29, %v290_v55  ;;  %v2595_v29 = vsel %vm386_vm1, %v408_v23, %v410_v34  ;;  %v2652_v34 = vsel %vm386_vm1, %v413_v57, %v415_v12  ;;  %v420_v12 = vrot.slane %v191_v24, 2 }
  0x80   : > { %3571 = vst [vmem:[#allocation6_spill] sm:$0xff] %v2652_v34 }
  0x81   : > { %1155 = vmatmul.f32.gmra.mxu0 %v2467_v40 }
  0x83   : > { %819 = vmatmul.f32.gmra.mxu1 %v283_v32  ;;  %932 = vmatmul.f32.gmra.mxu2 %v2471_v43  ;;  %v638_v32 = vld [vmem:[%s3520_s1 + $0x348] sm:$0xff] }
  0x85   : > { %1045 = vmatmul.f32.gmra.mxu3 %v2373_v49  ;;  %v640_v49 = vld [vmem:[%s3520_s1 + $0x358] sm:$0xff] }
  0x86   : > { %1363 = vmatpush.msra.mxu2 %v640_v49  ;;  %v302_v49 = vrot.slane %v188_v44, 1  ;;  %v417_v44 = vrot.slane %v2290_v14, 2 }
  0x89   : > { %1158 = vmatmul.f32.gmra.mxu0 %v2482_v53 }
  0x8b   : > { %822 = vmatmul.f32.gmra.mxu1 %v2467_v40  ;;  %935 = vmatmul.f32.gmra.mxu2 %v2485_v54 }
  0x8d   : > { %1048 = vmatmul.f32.gmra.mxu3 %v2401_v59  ;;  %v294_v59 = vrot.slane %v2101_v16, 1 }
  0x8f   : > { %v2537_v13 = vsel %vm273_vm0, %v294_v59, %v295_v9  ;;  %v2620_v59 = vsel %vm386_vm1, %v412_v56, %v413_v57  ;;  %v304_v9 = vrot.slane %v2290_v14, 1 }
  0x91   : > { %1161 = vmatmul.f32.gmra.mxu0 %v2500_v0 }
  0x93   : > { %825 = vmatmul.f32.gmra.mxu1 %v2482_v53  ;;  %938 = vmatmul.f32.gmra.mxu2 %v2507_v3 }
  0x95   : > { %1051 = vmatmul.f32.gmra.mxu3 %v2421_v6  ;;  %v639_v6 = vld [vmem:[%s3520_s1 + $0x350] sm:$0xff] }
  0x96   : > { %1364 = vmatpush.msra.mxu2 %v639_v6  ;;  %v305_v6 = vrot.slane %v2339_v35, 1 }
  0x98   : > { %1365 = vmatpush.msra.mxu2 %v638_v32  ;;  %v2640_v22 = vsel %vm273_vm0, %v304_v9, %v305_v6  ;;  %v309_v9 = vrot.slane %v2379_v51, 1 }
  0x99   : > { %1164 = vmatmul.f32.gmra.mxu0 %v2519_v26  ;;  %3570 = vst [vmem:[#allocation5_spill] sm:$0xff] %v2640_v22 }
  0x9a   : > { %1366 = vmatpush.msra.mxu2 %v637_v11  ;;  %v636_v11 = vld [vmem:[%s3520_s1 + $0x338] sm:$0xff] }
  0x9b   : > { %828 = vmatmul.f32.gmra.mxu1 %v2500_v0  ;;  %941 = vmatmul.f32.gmra.mxu2 %v2522_v42 }
  0x9c   : > { %1367 = vmatpush.msra.mxu2 %v636_v11 }
  0x9d   : > { %1054 = vmatmul.f32.gmra.mxu3 %v2101_v16  ;;  %v299_v16 = vrot.slane %v2192_v46, 1 }
  0xa1   : > { %1167 = vmatmul.f32.gmra.mxu0 %v2537_v13 }
  0xa3   : > { %831 = vmatmul.f32.gmra.mxu1 %v2519_v26  ;;  %944 = vmatmul.f32.gmra.mxu2 %v2544_v20 }
  0xa5   : > { %1057 = vmatmul.f32.gmra.mxu3 %v2143_v30  ;;  %v300_v30 = vrot.slane %v2241_v62, 1 }
  0xa7   : > { %v2583_v39 = vsel %vm273_vm0, %v299_v16, %v300_v30  ;;  %v2612_v5 = vsel %vm273_vm0, %v300_v30, %v302_v49  ;;  %v621_v16 = vld [vmem:[%s3520_s1 + $0x2c0] sm:$0xff] }
  0xa8   : > { %v2558_v27 = vpop.f32.mrf.mxu1  ;;  %3568 = vst [vmem:[#allocation3_spill] sm:$0xff] %v2612_v5  ;;  %1253 = vmatpush.msra.mxu1 %v621_v16 }
  0xa9   : > { %1170 = vmatmul.f32.gmra.mxu0 %v2556_v25 }
  0xab   : > { %834 = vmatmul.f32.gmra.mxu1 %v2537_v13  ;;  %947 = vmatmul.f32.gmra.mxu2 %v2561_v28 }
  0xad   : > { %1060 = vmatmul.f32.gmra.mxu3 %v2192_v46 }
  0xae   : > { %v746_v37 = vpop.f32.mrf.mxu2  ;;  %v2580_v38 = vpop.f32.mrf.mxu0 }
  0xaf   : > { %v2586_v41 = vadd.f32 %v2574_v58, %v746_v37  ;;  %v307_v37 = vrot.slane %v191_v24, 1  ;;  %v620_v24 = vld [vmem:[%s3520_s1 + $0x2b8] sm:$0xff] }
  0xb0   : > { %v2592_v48 = vpop.f32.mrf.mxu1  ;;  %v770_v50 = vpop.f32.mrf.mxu3  ;;  %1254 = vmatpush.msra.mxu1 %v620_v24 }
  0xb1   : > { %v2598_v55 = vadd.f32 %v2574_v58, %v770_v50  ;;  %1173 = vmatmul.f32.gmra.mxu0 %v2583_v39  ;;  %v669_v50 = vld [vmem:[%s3520_s1 + $0x440] sm:$0xff]  ;;  %v2669_v57 = vsel %vm273_vm0, %v305_v6, %v307_v37  ;;  %v310_v6 = vrot.slane %v2404_v60, 1 }
  0xb2   : > { %3573 = vst [vmem:[#allocation8_spill] sm:$0xff] %v2669_v57  ;;  %1592 = vmatpush.msra.mxu0 %v669_v50 }
  0xb3   : > { %3567 = vst [vmem:[#allocation2_spill] sm:$0xff] %v2598_v55  ;;  %837 = vmatmul.f32.gmra.mxu1 %v2556_v25  ;;  %950 = vmatmul.f32.gmra.mxu2 %v2595_v29 }
  0xb5   : > { %1063 = vmatmul.f32.gmra.mxu3 %v2241_v62 }
  0xb6   : > { %v749_v2 = vpop.f32.mrf.mxu2  ;;  %v2609_v4 = vpop.f32.mrf.mxu0 }
  0xb7   : > { %v2615_v7 = vadd.f32 %v2574_v58, %v749_v2 }
  0xb8   : > { %v2617_v8 = vpop.f32.mrf.mxu1  ;;  %v773_v46 = vpop.f32.mrf.mxu3 }
  0xb9   : > { %v2623_v62 = vadd.f32 %v2574_v58, %v773_v46  ;;  %1176 = vmatmul.f32.gmra.mxu0 %v2612_v5  ;;  %v2677_v46 = vsel %vm386_vm1, %v417_v44, %v418_v45  ;;  %v194_v44 = vld [vmem:[%s2095_s22 + $0xb8] sm:$0x3] }
  0xba   : > { %3574 = vst [vmem:[#allocation9_spill] sm:$0xff] %v2677_v46 }
  0xbb   : > { %3569 = vst [vmem:[#allocation4_spill] sm:$0xff] %v2623_v62  ;;  %840 = vmatmul.f32.gmra.mxu1 %v2583_v39  ;;  %953 = vmatmul.f32.gmra.mxu2 %v2620_v59 }
  0xbd   : > { %1066 = vmatmul.f32.gmra.mxu3 %v2290_v14 }
  0xbe   : > { %v752_v19 = vpop.f32.mrf.mxu2  ;;  %v2637_v21 = vpop.f32.mrf.mxu0 }
  0xbf   : > { %v2643_v23 = vadd.f32 %v2574_v58, %v752_v19 }
  0xc0   : > { %v2649_v30 = vpop.f32.mrf.mxu1  ;;  %v776_v32 = vpop.f32.mrf.mxu3 }
  0xc1   : > { %v2655_v10 = vadd.f32 %v2574_v58, %v776_v32  ;;  %1179 = vmatmul.f32.gmra.mxu0 %v2640_v22  ;;  %v2697_v32 = vsel %vm273_vm0, %v309_v9, %v310_v6  ;;  %v312_v9 = vrot.slane %v194_v44, 1 }
  0xc2   : > { %3576 = vst [vmem:[#allocation11_spill] sm:$0xff] %v2697_v32 }
  0xc3   : > { %3572 = vst [vmem:[#allocation7_spill] sm:$0xff] %v2655_v10  ;;  %843 = vmatmul.f32.gmra.mxu1 %v2612_v5  ;;  %956 = vmatmul.f32.gmra.mxu2 %v2652_v34 }
  0xc5   : > { %1069 = vmatmul.f32.gmra.mxu3 %v2339_v35 }
  0xc6   : > { %v755_v49 = vpop.f32.mrf.mxu2  ;;  %v2666_v56 = vpop.f32.mrf.mxu0 }
  0xc7   : > { %v2672_v1 = vadd.f32 %v2574_v58, %v755_v49 }
  0xc8   : > { %v2674_v2 = vpop.f32.mrf.mxu1  ;;  %v779_v14 = vpop.f32.mrf.mxu3 }
  0xc9   : > { %v2680_v35 = vadd.f32 %v2574_v58, %v779_v14  ;;  %1182 = vmatmul.f32.gmra.mxu0 %v2669_v57  ;;  %v2709_v14 = vsel %vm386_vm1, %v418_v45, %v420_v12  ;;  %v668_v45 = vld [vmem:[%s3520_s1 + $0x438] sm:$0xff] }
  0xca   : > { %3577 = vst [vmem:[#allocation12_spill] sm:$0xff] %v2709_v14  ;;  %1593 = vmatpush.msra.mxu0 %v668_v45  ;;  %v651_v45 = vld [vmem:[%s3520_s1 + $0x3b0] sm:$0xff] }
  0xcb   : > { %3575 = vst [vmem:[#allocation10_spill] sm:$0xff] %v2680_v35  ;;  %846 = vmatmul.f32.gmra.mxu1 %v2640_v22  ;;  %959 = vmatmul.f32.gmra.mxu2 %v2677_v46  ;;  %v319_v22 = vrot.slane %v2195_v47, 1 }
  0xcc   : > { %1481 = vmatpush.msra.mxu3 %v651_v45  ;;  %v427_v45 = vrot.slane %v2104_v17, 2 }
  0xcd   : > { %1072 = vmatmul.f32.gmra.mxu3 %v2379_v51 }
  0xce   : > { %v758_v19 = vpop.f32.mrf.mxu2  ;;  %v2694_v16 = vpop.f32.mrf.mxu0 }
  0xcf   : > { %v2700_v37 = vadd.f32 %v2574_v58, %v758_v19  ;;  %v423_v19 = vrot.slane %v2404_v60, 2 }
  0xd0   : > { %v2706_v50 = vpop.f32.mrf.mxu1  ;;  %v782_v49 = vpop.f32.mrf.mxu3 }
  0xd1   : > { %v2712_v11 = vadd.f32 %v2574_v58, %v782_v49  ;;  %1185 = vmatmul.f32.gmra.mxu0 %v2697_v32  ;;  %v2726_v49 = vsel %vm273_vm0, %v310_v6, %v312_v9  ;;  %v2734_v10 = vsel %vm386_vm1, %v422_v18, %v423_v19  ;;  %v315_v6 = vrot.slane %v2146_v31, 1  ;;  %v635_v9 = vld [vmem:[%s3520_s1 + $0x330] sm:$0xff] }
  0xd2   : > { %3579 = vst [vmem:[#allocation14_spill] sm:$0xff] %v2726_v49  ;;  %v425_v18 = vrot.slane %v194_v44, 2  ;;  %1368 = vmatpush.msra.mxu2 %v635_v9  ;;  %v619_v44 = vld [vmem:[%s3520_s1 + $0x2b0] sm:$0xff] }
  0xd3   : > { %3578 = vst [vmem:[#allocation13_spill] sm:$0xff] %v2712_v11  ;;  %849 = vmatmul.f32.gmra.mxu1 %v2669_v57  ;;  %962 = vmatmul.f32.gmra.mxu2 %v2709_v14  ;;  %v314_v14 = vrot.slane %v2104_v17, 1 }
  0xd4   : > { %3580 = vst [vmem:[#allocation15_spill] sm:$0xff] %v2734_v10  ;;  %v2766_v62 = vsel %vm386_vm1, %v423_v19, %v425_v18  ;;  %1255 = vmatpush.msra.mxu1 %v619_v44  ;;  %v667_v19 = vld [vmem:[%s3520_s1 + $0x430] sm:$0xff] }
  0xd5   : > { %1075 = vmatmul.f32.gmra.mxu3 %v2404_v60  ;;  %3583 = vst [vmem:[#allocation18_spill] sm:$0xff] %v2766_v62  ;;  %1594 = vmatpush.msra.mxu0 %v667_v19 }
  0xd6   : > { %v761_v12 = vpop.f32.mrf.mxu2  ;;  %v2723_v24 = vpop.f32.mrf.mxu0 }
  0xd7   : > { %v2729_v11 = vadd.f32 %v2574_v58, %v761_v12 }
  0xd8   : > { %v2731_v35 = vpop.f32.mrf.mxu1  ;;  %v785_v51 = vpop.f32.mrf.mxu3 }
  0xd9   : > { %v2737_v60 = vadd.f32 %v2574_v58, %v785_v51  ;;  %1188 = vmatmul.f32.gmra.mxu0 %v2726_v49 }
  0xdb   : > { %3581 = vst [vmem:[#allocation16_spill] sm:$0xff] %v2737_v60  ;;  %852 = vmatmul.f32.gmra.mxu1 %v2697_v32  ;;  %965 = vmatmul.f32.gmra.mxu2 %v2734_v10  ;;  %v2754_v60 = vsel %vm273_vm0, %v314_v14, %v315_v6  ;;  %v197_v32 = vld [vmem:[%s2095_s22 + $0xd0] sm:$0x3] }
  0xdc   : > { %3582 = vst [vmem:[#allocation17_spill] sm:$0xff] %v2754_v60  ;;  %v317_v14 = vrot.slane %v197_v32, 1 }
  0xdd   : > { %1078 = vmatmul.f32.gmra.mxu3 %v2104_v17 }
  0xde   : > { %v764_v12 = vpop.f32.mrf.mxu2  ;;  %v2751_v51 = vpop.f32.mrf.mxu0  ;;  %v2783_v44 = vsel %vm273_vm0, %v315_v6, %v317_v14  ;;  %v320_v6 = vrot.slane %v2244_v63, 1  ;;  %v699_v14 = vadd.f32 %v2574_v58, %v2580_v38 }
  0xdf   : > { %v2757_v10 = vadd.f32 %v2574_v58, %v764_v12  ;;  %v428_v12 = vrot.slane %v2146_v31, 2 }
  0xe0   : > { %v2763_v9 = vpop.f32.mrf.mxu1  ;;  %v788_v57 = vpop.f32.mrf.mxu3  ;;  %v2809_v38 = vsel %vm273_vm0, %v319_v22, %v320_v6  ;;  %v702_v22 = vadd.f32 %v2574_v58, %v2609_v4 }
  0xe1   : > { %v2769_v46 = vadd.f32 %v2574_v58, %v788_v57  ;;  %1191 = vmatmul.f32.gmra.mxu0 %v2754_v60 }
  0xe3   : > { %3584 = vst [vmem:[#allocation19_spill] sm:$0xff] %v2769_v46  ;;  %855 = vmatmul.f32.gmra.mxu1 %v2726_v49  ;;  %968 = vmatmul.f32.gmra.mxu2 %v2766_v62  ;;  %v2789_v49 = vsel %vm386_vm1, %v427_v45, %v428_v12  ;;  %v634_v45 = vld [vmem:[%s3520_s1 + $0x328] sm:$0xff] }
  0xe4   : > { %3585 = vst [vmem:[#allocation20_spill] sm:$0xff] %v2789_v49  ;;  %1369 = vmatpush.msra.mxu2 %v634_v45 }
  0xe5   : > { %1081 = vmatmul.f32.gmra.mxu3 %v2146_v31 }
  0xe6   : > { %v767_v18 = vpop.f32.mrf.mxu2  ;;  %v2780_v57 = vpop.f32.mrf.mxu0 }
  0xe7   : > { %v2786_v46 = vadd.f32 %v2574_v58, %v767_v18  ;;  %v650_v18 = vld [vmem:[%s3520_s1 + $0x3a8] sm:$0xff] }
  0xe8   : > { %v791_v62 = vpop.f32.mrf.mxu3  ;;  %v811_v17 = vpop.f32.mrf.mxu1  ;;  %1482 = vmatpush.msra.mxu3 %v650_v18 }
  0xe9   : > { %v2792_v31 = vadd.f32 %v2574_v58, %v791_v62  ;;  %1194 = vmatmul.f32.gmra.mxu0 %v2783_v44  ;;  %v430_v62 = vrot.slane %v197_v32, 2  ;;  %v812_v19 = vadd.f32 %v811_v17, %v699_v14  ;;  %v618_v32 = vld [vmem:[%s3520_s1 + $0x2a8] sm:$0xff] }
  0xea   : > { %1256 = vmatpush.msra.mxu1 %v618_v32 }
  0xeb   : > { %3586 = vst [vmem:[#allocation21_spill] sm:$0xff] %v2792_v31  ;;  %858 = vmatmul.f32.gmra.mxu1 %v2754_v60  ;;  %971 = vmatmul.f32.gmra.mxu2 %v2789_v49  ;;  %v200_v60 = vld [vmem:[%s2095_s22 + $0xe8] sm:$0x3]  ;;  %v2816_v14 = vsel %vm386_vm1, %v428_v12, %v430_v62 }
  0xec   : > { %v322_v5 = vrot.slane %v200_v60, 1 }
  0xed   : > { %1084 = vmatmul.f32.gmra.mxu3 %v2195_v47 }
  0xee   : > { %v924_v31 = vpop.f32.mrf.mxu2  ;;  %v1150_v55 = vpop.f32.mrf.mxu0 }
  0xef   : > { %v925_v49 = vadd.f32 %v924_v31, %v812_v19  ;;  %v432_v31 = vrot.slane %v2195_v47, 2  ;;  %v433_v19 = vrot.slane %v2244_v63, 2 }
  0xf0   : > { %v814_v45 = vpop.f32.mrf.mxu1  ;;  %v1037_v17 = vpop.f32.mrf.mxu3 }
  0xf1   : > { %v1038_v34 = vadd.f32 %v1037_v17, %v925_v49  ;;  %1197 = vmatmul.f32.gmra.mxu0 %v2809_v38  ;;  %v815_v12 = vadd.f32 %v814_v45, %v702_v22  ;;  %v666_v49 = vld [vmem:[%s3520_s1 + $0x428] sm:$0xff]  ;;  %v2835_v47 = vsel %vm386_vm1, %v432_v31, %v433_v19  ;;  %v325_v45 = vrot.slane %v2342_v36, 1 }
  0xf2   : > { %1595 = vmatpush.msra.mxu0 %v666_v49  ;;  %v705_v22 = vadd.f32 %v2574_v58, %v2637_v21  ;;  %v435_v31 = vrot.slane %v200_v60, 2  ;;  %v649_v49 = vld [vmem:[%s3520_s1 + $0x3a0] sm:$0xff] }
  0xf3   : > { %v2821_v18 = vadd.f32 %v1150_v55, %v1038_v34  ;;  %861 = vmatmul.f32.gmra.mxu1 %v2783_v44  ;;  %974 = vmatmul.f32.gmra.mxu2 %v2816_v14  ;;  %v2832_v55 = vsel %vm273_vm0, %v320_v6, %v322_v5  ;;  %v633_v6 = vld [vmem:[%s3520_s1 + $0x320] sm:$0xff] }
  0xf4   : > { %1370 = vmatpush.msra.mxu2 %v633_v6  ;;  %1483 = vmatpush.msra.mxu3 %v649_v49  ;;  %v617_v60 = vld [vmem:[%s3520_s1 + $0x2a0] sm:$0xff] }
  0xf5   : > { %3587 = vst [vmem:[#allocation22_spill] sm:$0xff] %v2821_v18  ;;  %1087 = vmatmul.f32.gmra.mxu3 %v2244_v63  ;;  %v324_v63 = vrot.slane %v2293_v15, 1  ;;  %1257 = vmatpush.msra.mxu1 %v617_v60 }
  0xf6   : > { %v927_v62 = vpop.f32.mrf.mxu2  ;;  %v1153_v32 = vpop.f32.mrf.mxu0 }
  0xf7   : > { %v928_v4 = vadd.f32 %v927_v62, %v815_v12  ;;  %v2854_v62 = vsel %vm273_vm0, %v324_v63, %v325_v45  ;;  %v708_v63 = vadd.f32 %v2574_v58, %v2666_v56 }
  0xf8   : > { %v817_v34 = vpop.f32.mrf.mxu1  ;;  %v1040_v17 = vpop.f32.mrf.mxu3 }
  0xf9   : > { %v1041_v18 = vadd.f32 %v1040_v17, %v928_v4  ;;  %1200 = vmatmul.f32.gmra.mxu0 %v2832_v55  ;;  %v818_v12 = vadd.f32 %v817_v34, %v705_v22  ;;  %v203_v4 = vld [vmem:[%s2095_s22 + $0x100] sm:$0x3]  ;;  %v2861_v22 = vsel %vm386_vm1, %v433_v19, %v435_v31 }
  0xfa   : > { %v665_v31 = vld [vmem:[%s3520_s1 + $0x420] sm:$0xff] }
  0xfb   : > { %v2842_v5 = vadd.f32 %v1153_v32, %v1041_v18  ;;  %864 = vmatmul.f32.gmra.mxu1 %v2809_v38  ;;  %977 = vmatmul.f32.gmra.mxu2 %v2835_v47 }
  0xfc   : > { %1596 = vmatpush.msra.mxu0 %v665_v31  ;;  %v648_v31 = vld [vmem:[%s3520_s1 + $0x398] sm:$0xff] }
  0xfd   : > { %3588 = vst [vmem:[#allocation23_spill] sm:$0xff] %v2842_v5  ;;  %1090 = vmatmul.f32.gmra.mxu3 %v2293_v15  ;;  %v327_v5 = vrot.slane %v203_v4, 1 }
  0xfe   : > { %v930_v21 = vpop.f32.mrf.mxu2  ;;  %v1156_v18 = vpop.f32.mrf.mxu0  ;;  %1484 = vmatpush.msra.mxu3 %v648_v31 }
  0xff   : > { %v931_v32 = vadd.f32 %v930_v21, %v818_v12  ;;  %v437_v12 = vrot.slane %v2293_v15, 2  ;;  %v438_v21 = vrot.slane %v2342_v36, 2  ;;  %v2877_v56 = vsel %vm273_vm0, %v325_v45, %v327_v5  ;;  %v632_v5 = vld [vmem:[%s3520_s1 + $0x318] sm:$0xff] }
 0x100   : > { %v820_v17 = vpop.f32.mrf.mxu1  ;;  %v1043_v34 = vpop.f32.mrf.mxu3  ;;  %1371 = vmatpush.msra.mxu2 %v632_v5 }
 0x101   : > { %v1044_v6 = vadd.f32 %v1043_v34, %v931_v32  ;;  %1203 = vmatmul.f32.gmra.mxu0 %v2854_v62  ;;  %v821_v19 = vadd.f32 %v820_v17, %v708_v63  ;;  %v2880_v15 = vsel %vm386_vm1, %v437_v12, %v438_v21  ;;  %v330_v17 = vrot.slane %v2407_v61, 1 }
 0x102   : > { %v711_v63 = vadd.f32 %v2574_v58, %v2694_v16  ;;  %v440_v12 = vrot.slane %v203_v4, 2  ;;  %v616_v4 = vld [vmem:[%s3520_s1 + $0x298] sm:$0xff] }
 0x103   : > { %v2866_v49 = vadd.f32 %v1156_v18, %v1044_v6  ;;  %867 = vmatmul.f32.gmra.mxu1 %v2832_v55  ;;  %980 = vmatmul.f32.gmra.mxu2 %v2861_v22 }
 0x104   : > { %1258 = vmatpush.msra.mxu1 %v616_v4 }
 0x105   : > { %3589 = vst [vmem:[#allocation24_spill] sm:$0xff] %v2866_v49  ;;  %1093 = vmatmul.f32.gmra.mxu3 %v2342_v36  ;;  %v329_v36 = vrot.slane %v2382_v52, 1 }
 0x106   : > { %v933_v32 = vpop.f32.mrf.mxu2  ;;  %v1159_v60 = vpop.f32.mrf.mxu0 }
 0x107   : > { %v934_v18 = vadd.f32 %v933_v32, %v821_v19  ;;  %v2899_v32 = vsel %vm273_vm0, %v329_v36, %v330_v17  ;;  %v714_v36 = vadd.f32 %v2574_v58, %v2723_v24 }
 0x108   : > { %v823_v34 = vpop.f32.mrf.mxu1  ;;  %v1046_v6 = vpop.f32.mrf.mxu3 }
 0x109   : > { %v1047_v49 = vadd.f32 %v1046_v6, %v934_v18  ;;  %1206 = vmatmul.f32.gmra.mxu0 %v2877_v56  ;;  %v824_v19 = vadd.f32 %v823_v34, %v711_v63  ;;  %v206_v18 = vld [vmem:[%s2095_s22 + $0x118] sm:$0x3]  ;;  %v2906_v63 = vsel %vm386_vm1, %v438_v21, %v440_v12  ;;  %v443_v21 = vrot.slane %v2407_v61, 2 }
 0x10a   : > { %3591 = vst [vmem:[#allocation26_spill] sm:$0xff] %v2906_v63 }
 0x10b   : > { %v2887_v45 = vadd.f32 %v1159_v60, %v1047_v49  ;;  %870 = vmatmul.f32.gmra.mxu1 %v2854_v62  ;;  %983 = vmatmul.f32.gmra.mxu2 %v2880_v15 }
 0x10d   : > { %3590 = vst [vmem:[#allocation25_spill] sm:$0xff] %v2887_v45  ;;  %1096 = vmatmul.f32.gmra.mxu3 %v2382_v52  ;;  %v332_v45 = vrot.slane %v206_v18, 1 }
 0x10e   : > { %v936_v16 = vpop.f32.mrf.mxu2  ;;  %v1162_v49 = vpop.f32.mrf.mxu0 }
 0x10f   : > { %v937_v60 = vadd.f32 %v936_v16, %v824_v19  ;;  %v442_v19 = vrot.slane %v2382_v52, 2  ;;  %v664_v16 = vld [vmem:[%s3520_s1 + $0x418] sm:$0xff] }
 0x110   : > { %v826_v6 = vpop.f32.mrf.mxu1  ;;  %v1049_v34 = vpop.f32.mrf.mxu3  ;;  %1597 = vmatpush.msra.mxu0 %v664_v16 }
 0x111   : > { %v1050_v5 = vadd.f32 %v1049_v34, %v937_v60  ;;  %1209 = vmatmul.f32.gmra.mxu0 %v2899_v32  ;;  %v827_v12 = vadd.f32 %v826_v6, %v714_v36  ;;  %v2922_v60 = vsel %vm273_vm0, %v330_v17, %v332_v45  ;;  %v2925_v52 = vsel %vm386_vm1, %v442_v19, %v443_v21  ;;  %v2933_v36 = vld [vmem:[%s2095_s22 + $0x128] sm:$0xff]  ;;  %v631_v19 = vld [vmem:[%s3520_s1 + $0x310] sm:$0xff] }
 0x112   : > { %3593 = vst [vmem:[#allocation28_spill] sm:$0xff] %v2925_v52  ;;  %v717_v17 = vadd.f32 %v2574_v58, %v2751_v51  ;;  %1372 = vmatpush.msra.mxu2 %v631_v19 }
 0x113   : > { %v2911_v31 = vadd.f32 %v1162_v49, %v1050_v5  ;;  %873 = vmatmul.f32.gmra.mxu1 %v2877_v56  ;;  %986 = vmatmul.f32.gmra.mxu2 %v2906_v63  ;;  %v335_v63 = vrot.slane %v2933_v36, 1 }
 0x115   : > { %3592 = vst [vmem:[#allocation27_spill] sm:$0xff] %v2911_v31  ;;  %1099 = vmatmul.f32.gmra.mxu3 %v2407_v61  ;;  %v2929_v61 = vld [vmem:[%s2095_s22 + $0x120] sm:$0xff] }
 0x116   : > { %v939_v24 = vpop.f32.mrf.mxu2  ;;  %v1165_v49 = vpop.f32.mrf.mxu0  ;;  %3594 = vst [vmem:[#allocation29_spill] sm:$0xff] %v2929_v61  ;;  %v334_v6 = vrot.slane %v2929_v61, 1 }
 0x117   : > { %v940_v4 = vadd.f32 %v939_v24, %v827_v12  ;;  %v445_v12 = vrot.slane %v206_v18, 2  ;;  %v647_v24 = vld [vmem:[%s3520_s1 + $0x390] sm:$0xff] }
 0x118   : > { %v829_v34 = vpop.f32.mrf.mxu1  ;;  %v1052_v5 = vpop.f32.mrf.mxu3  ;;  %1485 = vmatpush.msra.mxu3 %v647_v24  ;;  %v615_v18 = vld [vmem:[%s3520_s1 + $0x290] sm:$0xff] }
 0x119   : > { %v1053_v31 = vadd.f32 %v1052_v5, %v940_v4  ;;  %1212 = vmatmul.f32.gmra.mxu0 %v2922_v60  ;;  %v830_v16 = vadd.f32 %v829_v34, %v717_v17  ;;  %v209_v5 = vld [vmem:[%s2095_s22 + $0x130] sm:$0x3]  ;;  %v2957_v17 = vsel %vm386_vm1, %v443_v21, %v445_v12  ;;  %1259 = vmatpush.msra.mxu1 %v615_v18  ;;  %v448_v21 = vrot.slane %v2933_v36, 2 }
 0x11a   : > { %3596 = vst [vmem:[#allocation31_spill] sm:$0xff] %v2957_v17 }
 0x11b   : > { %v2938_v45 = vadd.f32 %v1165_v49, %v1053_v31  ;;  %876 = vmatmul.f32.gmra.mxu1 %v2899_v32  ;;  %989 = vmatmul.f32.gmra.mxu2 %v2925_v52  ;;  %v2950_v49 = vsel %vm273_vm0, %v334_v6, %v335_v63  ;;  %v337_v52 = vrot.slane %v209_v5, 1  ;;  %v720_v6 = vadd.f32 %v2574_v58, %v2780_v57 }
 0x11d   : > { %3595 = vst [vmem:[#allocation30_spill] sm:$0xff] %v2938_v45  ;;  %1102 = vmatmul.f32.gmra.mxu3 %v2929_v61 }
 0x11e   : > { %v942_v51 = vpop.f32.mrf.mxu2  ;;  %v1168_v31 = vpop.f32.mrf.mxu0 }
 0x11f   : > { %v943_v4 = vadd.f32 %v942_v51, %v830_v16  ;;  %v447_v16 = vrot.slane %v2929_v61, 2  ;;  %v663_v51 = vld [vmem:[%s3520_s1 + $0x410] sm:$0xff] }
 0x120   : > { %v832_v19 = vpop.f32.mrf.mxu1  ;;  %v1055_v34 = vpop.f32.mrf.mxu3  ;;  %1598 = vmatpush.msra.mxu0 %v663_v51 }
 0x121   : > { %v1056_v45 = vadd.f32 %v1055_v34, %v943_v4  ;;  %1215 = vmatmul.f32.gmra.mxu0 %v2950_v49  ;;  %v833_v12 = vadd.f32 %v832_v19, %v720_v6  ;;  %v2984_v6 = vld [vmem:[%s2095_s22 + $0x140] sm:$0xff] }
 0x122   : > { %3601 = vst [vmem:[#allocation36_spill] sm:$0xff] %v2984_v6 }
 0x123   : > { %v2962_v24 = vadd.f32 %v1168_v31, %v1056_v45  ;;  %879 = vmatmul.f32.gmra.mxu1 %v2922_v60  ;;  %992 = vmatmul.f32.gmra.mxu2 %v2957_v17  ;;  %v2973_v31 = vsel %vm273_vm0, %v335_v63, %v337_v52  ;;  %v340_v17 = vrot.slane %v2984_v6, 1  ;;  %v723_v63 = vadd.f32 %v2574_v58, %v2558_v27 }
 0x124   : > { %3598 = vst [vmem:[#allocation33_spill] sm:$0xff] %v2973_v31 }
 0x125   : > { %3597 = vst [vmem:[#allocation32_spill] sm:$0xff] %v2962_v24  ;;  %1105 = vmatmul.f32.gmra.mxu3 %v2933_v36  ;;  %v2976_v24 = vsel %vm386_vm1, %v447_v16, %v448_v21  ;;  %v2980_v36 = vld [vmem:[%s2095_s22 + $0x138] sm:$0xff]  ;;  %v630_v16 = vld [vmem:[%s3520_s1 + $0x308] sm:$0xff] }
 0x126   : > { %v945_v57 = vpop.f32.mrf.mxu2  ;;  %v1171_v45 = vpop.f32.mrf.mxu0  ;;  %3599 = vst [vmem:[#allocation34_spill] sm:$0xff] %v2976_v24  ;;  %v339_v19 = vrot.slane %v2980_v36, 1  ;;  %1373 = vmatpush.msra.mxu2 %v630_v16 }
 0x127   : > { %v946_v4 = vadd.f32 %v945_v57, %v833_v12  ;;  %3600 = vst [vmem:[#allocation35_spill] sm:$0xff] %v2980_v36  ;;  %v450_v12 = vrot.slane %v209_v5, 2  ;;  %v646_v57 = vld [vmem:[%s3520_s1 + $0x388] sm:$0xff] }
 0x128   : > { %v835_v18 = vpop.f32.mrf.mxu1  ;;  %v1058_v34 = vpop.f32.mrf.mxu3  ;;  %1486 = vmatpush.msra.mxu3 %v646_v57  ;;  %v614_v5 = vld [vmem:[%s3520_s1 + $0x288] sm:$0xff] }
 0x129   : > { %v1059_v61 = vadd.f32 %v1058_v34, %v946_v4  ;;  %1218 = vmatmul.f32.gmra.mxu0 %v2973_v31  ;;  %v836_v51 = vadd.f32 %v835_v18, %v723_v63  ;;  %v212_v34 = vld [vmem:[%s2095_s22 + $0x148] sm:$0x3]  ;;  %v3008_v63 = vsel %vm386_vm1, %v448_v21, %v450_v12  ;;  %1260 = vmatpush.msra.mxu1 %v614_v5  ;;  %v453_v21 = vrot.slane %v2984_v6, 2 }
 0x12a   : > { %3604 = vst [vmem:[#allocation39_spill] sm:$0xff] %v3008_v63 }
 0x12b   : > { %v2989_v52 = vadd.f32 %v1171_v45, %v1059_v61  ;;  %882 = vmatmul.f32.gmra.mxu1 %v2950_v49  ;;  %995 = vmatmul.f32.gmra.mxu2 %v2976_v24  ;;  %v3001_v45 = vsel %vm273_vm0, %v339_v19, %v340_v17  ;;  %v342_v24 = vrot.slane %v212_v34, 1  ;;  %v726_v19 = vadd.f32 %v2574_v58, %v2592_v48 }
 0x12c   : > { %3603 = vst [vmem:[#allocation38_spill] sm:$0xff] %v3001_v45 }
 0x12d   : > { %3602 = vst [vmem:[#allocation37_spill] sm:$0xff] %v2989_v52  ;;  %1108 = vmatmul.f32.gmra.mxu3 %v2980_v36 }
 0x12e   : > { %v948_v27 = vpop.f32.mrf.mxu2  ;;  %v1174_v61 = vpop.f32.mrf.mxu0 }
 0x12f   : > { %v949_v4 = vadd.f32 %v948_v27, %v836_v51  ;;  %v452_v51 = vrot.slane %v2980_v36, 2  ;;  %v662_v27 = vld [vmem:[%s3520_s1 + $0x408] sm:$0xff] }
 0x130   : > { %v838_v16 = vpop.f32.mrf.mxu1  ;;  %v1061_v18 = vpop.f32.mrf.mxu3  ;;  %1599 = vmatpush.msra.mxu0 %v662_v27 }
 0x131   : > { %v1062_v52 = vadd.f32 %v1061_v18, %v949_v4  ;;  %1221 = vmatmul.f32.gmra.mxu0 %v3001_v45  ;;  %v839_v12 = vadd.f32 %v838_v16, %v726_v19  ;;  %v3031_v16 = vld [vmem:[%s2095_s22 + $0x150] sm:$0xff] }
 0x132   : > { %3608 = vst [vmem:[#allocation43_spill] sm:$0xff] %v3031_v16  ;;  %v344_v19 = vrot.slane %v3031_v16, 1 }
 0x133   : > { %v3013_v57 = vadd.f32 %v1174_v61, %v1062_v52  ;;  %885 = vmatmul.f32.gmra.mxu1 %v2973_v31  ;;  %998 = vmatmul.f32.gmra.mxu2 %v3008_v63  ;;  %v3024_v61 = vsel %vm273_vm0, %v340_v17, %v342_v24  ;;  %v729_v17 = vadd.f32 %v2574_v58, %v2617_v8 }
 0x134   : > { %3606 = vst [vmem:[#allocation41_spill] sm:$0xff] %v3024_v61 }
 0x135   : > { %3605 = vst [vmem:[#allocation40_spill] sm:$0xff] %v3013_v57  ;;  %1111 = vmatmul.f32.gmra.mxu3 %v2984_v6  ;;  %v3027_v57 = vsel %vm386_vm1, %v452_v51, %v453_v21  ;;  %v3035_v6 = vld [vmem:[%s2095_s22 + $0x158] sm:$0xff]  ;;  %v629_v51 = vld [vmem:[%s3520_s1 + $0x300] sm:$0xff] }
 0x136   : > { %v951_v48 = vpop.f32.mrf.mxu2  ;;  %v1177_v52 = vpop.f32.mrf.mxu0  ;;  %3607 = vst [vmem:[#allocation42_spill] sm:$0xff] %v3027_v57  ;;  %v345_v63 = vrot.slane %v3035_v6, 1  ;;  %1374 = vmatpush.msra.mxu2 %v629_v51 }
 0x137   : > { %v952_v4 = vadd.f32 %v951_v48, %v839_v12  ;;  %3609 = vst [vmem:[#allocation44_spill] sm:$0xff] %v3035_v6  ;;  %v455_v12 = vrot.slane %v212_v34, 2  ;;  %v645_v48 = vld [vmem:[%s3520_s1 + $0x380] sm:$0xff] }
 0x138   : > { %v841_v5 = vpop.f32.mrf.mxu1  ;;  %v1064_v18 = vpop.f32.mrf.mxu3  ;;  %1487 = vmatpush.msra.mxu3 %v645_v48  ;;  %v613_v34 = vld [vmem:[%s3520_s1 + $0x280] sm:$0xff] }
 0x139   : > { %v1065_v36 = vadd.f32 %v1064_v18, %v952_v4  ;;  %1224 = vmatmul.f32.gmra.mxu0 %v3024_v61  ;;  %v842_v27 = vadd.f32 %v841_v5, %v729_v17  ;;  %v215_v18 = vld [vmem:[%s2095_s22 + $0x160] sm:$0x3]  ;;  %v3059_v17 = vsel %vm386_vm1, %v453_v21, %v455_v12  ;;  %1261 = vmatpush.msra.mxu1 %v613_v34  ;;  %v458_v21 = vrot.slane %v3035_v6, 2 }
 0x13a   : > { %3611 = vst [vmem:[#allocation46_spill] sm:$0xff] %v3059_v17 }
 0x13b   : > { %v3040_v24 = vadd.f32 %v1177_v52, %v1065_v36  ;;  %888 = vmatmul.f32.gmra.mxu1 %v3001_v45  ;;  %1001 = vmatmul.f32.gmra.mxu2 %v3027_v57  ;;  %v3052_v52 = vsel %vm273_vm0, %v344_v19, %v345_v63  ;;  %v347_v57 = vrot.slane %v215_v18, 1  ;;  %v732_v19 = vadd.f32 %v2574_v58, %v2649_v30 }
 0x13d   : > { %3610 = vst [vmem:[#allocation45_spill] sm:$0xff] %v3040_v24  ;;  %1114 = vmatmul.f32.gmra.mxu3 %v3031_v16 }
 0x13e   : > { %v954_v8 = vpop.f32.mrf.mxu2  ;;  %v1180_v36 = vpop.f32.mrf.mxu0 }
 0x13f   : > { %v955_v4 = vadd.f32 %v954_v8, %v842_v27  ;;  %v457_v27 = vrot.slane %v3031_v16, 2  ;;  %v661_v8 = vld [vmem:[%s3520_s1 + $0x400] sm:$0xff] }
 0x140   : > { %v844_v51 = vpop.f32.mrf.mxu1  ;;  %v1067_v5 = vpop.f32.mrf.mxu3  ;;  %1600 = vmatpush.msra.mxu0 %v661_v8 }
 0x141   : > { %v1068_v24 = vadd.f32 %v1067_v5, %v955_v4  ;;  %1227 = vmatmul.f32.gmra.mxu0 %v3052_v52  ;;  %v845_v12 = vadd.f32 %v844_v51, %v732_v19  ;;  %v3082_v51 = vld [vmem:[%s2095_s22 + $0x168] sm:$0xff] }
 0x142   : > { %3613 = vst [vmem:[#allocation48_spill] sm:$0xff] %v3082_v51  ;;  %v349_v19 = vrot.slane %v3082_v51, 1 }
 0x143   : > { %v3064_v48 = vadd.f32 %v1180_v36, %v1068_v24  ;;  %891 = vmatmul.f32.gmra.mxu1 %v3024_v61  ;;  %1004 = vmatmul.f32.gmra.mxu2 %v3059_v17  ;;  %v3075_v36 = vsel %vm273_vm0, %v345_v63, %v347_v57  ;;  %v735_v57 = vadd.f32 %v2574_v58, %v2674_v2  ;;  %v218_v61 = vld [vmem:[%s2095_s22 + $0x178] sm:$0x3] }
 0x145   : > { %3612 = vst [vmem:[#allocation47_spill] sm:$0xff] %v3064_v48  ;;  %1117 = vmatmul.f32.gmra.mxu3 %v3035_v6  ;;  %v3078_v48 = vsel %vm386_vm1, %v457_v27, %v458_v21  ;;  %v3086_v6 = vld [vmem:[%s2095_s22 + $0x170] sm:$0xff]  ;;  %v460_v27 = vrot.slane %v215_v18, 2  ;;  %v352_v18 = vrot.slane %v218_v61, 1 }
 0x146   : > { %v957_v30 = vpop.f32.mrf.mxu2  ;;  %v1183_v24 = vpop.f32.mrf.mxu0  ;;  %3614 = vst [vmem:[#allocation49_spill] sm:$0xff] %v3086_v6  ;;  %v350_v63 = vrot.slane %v3086_v6, 1 }
 0x147   : > { %v958_v4 = vadd.f32 %v957_v30, %v845_v12  ;;  %v3101_v2 = vsel %vm386_vm1, %v458_v21, %v460_v27  ;;  %v463_v21 = vrot.slane %v3086_v6, 2 }
 0x148   : > { %v847_v34 = vpop.f32.mrf.mxu1  ;;  %v1070_v5 = vpop.f32.mrf.mxu3  ;;  %3616 = vst [vmem:[#allocation51_spill] sm:$0xff] %v3101_v2  ;;  %v3114_v27 = vsel %vm273_vm0, %v350_v63, %v352_v18 }
 0x149   : > { %v1071_v16 = vadd.f32 %v1070_v5, %v958_v4  ;;  %1230 = vmatmul.f32.gmra.mxu0 %v3075_v36  ;;  %v848_v8 = vadd.f32 %v847_v34, %v735_v57  ;;  %v3097_v5 = vsel %vm273_vm0, %v349_v19, %v350_v63  ;;  %v462_v19 = vrot.slane %v3082_v51, 2 }
 0x14a   : > { %v741_v63 = vadd.f32 %v2574_v58, %v2731_v35 }
 0x14b   : > { %v3091_v12 = vadd.f32 %v1183_v24, %v1071_v16  ;;  %894 = vmatmul.f32.gmra.mxu1 %v3052_v52  ;;  %1007 = vmatmul.f32.gmra.mxu2 %v3078_v48  ;;  %v738_v24 = vadd.f32 %v2574_v58, %v2706_v50 }
 0x14d   : > { %3615 = vst [vmem:[#allocation50_spill] sm:$0xff] %v3091_v12  ;;  %1120 = vmatmul.f32.gmra.mxu3 %v3082_v51  ;;  %v3123_v12 = vld [vmem:[%s2095_s22 + $0x180] sm:$0xff]  ;;  %v3139_v51 = vld [vmem:[%s2095_s22 + $0x190] sm:$0x3] }
 0x14e   : > { %v960_v30 = vpop.f32.mrf.mxu2  ;;  %v1186_v4 = vpop.f32.mrf.mxu0 }
 0x14f   : > { %v961_v17 = vadd.f32 %v960_v30, %v848_v8  ;;  %v3117_v8 = vld [vmem:[%s2095_s22 + $0x188] sm:$0xff] }
 0x150   : > { %v850_v45 = vpop.f32.mrf.mxu1  ;;  %v1073_v31 = vpop.f32.mrf.mxu3 }
 0x151   : > { %v1074_v16 = vadd.f32 %v1073_v31, %v961_v17  ;;  %1233 = vmatmul.f32.gmra.mxu0 %v3097_v5  ;;  %v851_v57 = vadd.f32 %v850_v45, %v738_v24  ;;  %v502_v45 = vrot.slane %v3123_v12, 1  ;;  %v503_v24 = vrot.slane %v3117_v8, 1 }
 0x153   : > { %v3106_v34 = vadd.f32 %v1186_v4, %v1074_v16  ;;  %897 = vmatmul.f32.gmra.mxu1 %v3075_v36  ;;  %1010 = vmatmul.f32.gmra.mxu2 %v3101_v2  ;;  %v3120_v16 = vsel %vm386_vm1, %v462_v19, %v463_v21  ;;  %v465_v19 = vrot.slane %v218_v61, 2  ;;  %v505_v61 = vrot.slane %v3139_v51, 1 }
 0x155   : > { %3617 = vst [vmem:[#allocation52_spill] sm:$0xff] %v3106_v34  ;;  %1123 = vmatmul.f32.gmra.mxu3 %v3086_v6 }
 0x156   : > { %v963_v31 = vpop.f32.mrf.mxu2  ;;  %v1189_v17 = vpop.f32.mrf.mxu0 }
 0x157   : > { %v964_v50 = vadd.f32 %v963_v31, %v851_v57 }
 0x158   : > { %v853_v30 = vpop.f32.mrf.mxu1  ;;  %v1076_v4 = vpop.f32.mrf.mxu3 }
 0x159   : > { %v1077_v34 = vadd.f32 %v1076_v4, %v964_v50  ;;  %1236 = vmatmul.f32.gmra.mxu0 %v3114_v27  ;;  %v854_v57 = vadd.f32 %v853_v30, %v741_v63  ;;  %v3136_v4 = vsel %vm273_vm0, %v502_v45, %v503_v24  ;;  %v744_v30 = vadd.f32 %v2574_v58, %v2763_v9  ;;  %v1980_v9 = vld [vmem:[%s2095_s22 + $0x30] sm:$0xff] }
 0x15b   : > { %v3130_v18 = vadd.f32 %v1189_v17, %v1077_v34  ;;  %900 = vmatmul.f32.gmra.mxu1 %v3097_v5  ;;  %1013 = vmatmul.f32.gmra.mxu2 %v3120_v16  ;;  %v3142_v34 = vsel %vm386_vm1, %v463_v21, %v465_v19 }
 0x15d   : > { %3618 = vst [vmem:[#allocation53_spill] sm:$0xff] %v3130_v18  ;;  %1126 = vmatmul.f32.gmra.mxu3 %v3123_v12 }
 0x15e   : > { %v966_v31 = vpop.f32.mrf.mxu2  ;;  %v1192_v50 = vpop.f32.mrf.mxu0 }
 0x15f   : > { %v967_v6 = vadd.f32 %v966_v31, %v854_v57 }
 0x160   : > { %v856_v2 = vpop.f32.mrf.mxu1  ;;  %v1079_v35 = vpop.f32.mrf.mxu3 }
 0x161   : > { %v1080_v17 = vadd.f32 %v1079_v35, %v967_v6  ;;  %1239 = vmatmul.f32.gmra.mxu0 %v3136_v4  ;;  %v857_v45 = vadd.f32 %v856_v2, %v744_v30  ;;  %v3154_v6 = vsel %vm273_vm0, %v503_v24, %v505_v61 }
 0x163   : > { %v3148_v63 = vadd.f32 %v1192_v50, %v1080_v17  ;;  %903 = vmatmul.f32.gmra.mxu1 %v3114_v27  ;;  %1016 = vmatmul.f32.gmra.mxu2 %v3142_v34 }
 0x165   : > { %1129 = vmatmul.f32.gmra.mxu3 %v3117_v8 }
 0x166   : > { %v969_v21 = vpop.f32.mrf.mxu2  ;;  %v1195_v19 = vpop.f32.mrf.mxu0 }
 0x167   : > { %v970_v57 = vadd.f32 %v969_v21, %v857_v45 }
 0x168   : > { %v859_v31 = vpop.f32.mrf.mxu1  ;;  %v1082_v35 = vpop.f32.mrf.mxu3 }
 0x169   : > { %v1083_v18 = vadd.f32 %v1082_v35, %v970_v57  ;;  %1242 = vmatmul.f32.gmra.mxu0 %v3154_v6  ;;  %v860_v2 = vadd.f32 %v859_v31, %v2586_v41 }
 0x16b   : > { %v3157_v58 = vadd.f32 %v1195_v19, %v1083_v18  ;;  %1262 = vmatmul.f32.vlgmr.msra.gmra.mxu1 %v2451_v33  ;;  %1375 = vmatmul.f32.vlgmr.msra.gmra.mxu2 %v1980_v9  ;;  %v1981_v33 = vld [vmem:[%s2095_s22 + $0x38] sm:$0xff] }
 0x16d   : > { %1488 = vmatmul.f32.vlgmr.msra.gmra.mxu3 %v2467_v40 }
 0x16e   : > { %v972_v50 = vpop.f32.mrf.mxu2  ;;  %v1198_v24 = vpop.f32.mrf.mxu0 }
 0x16f   : > { %v973_v17 = vadd.f32 %v972_v50, %v860_v2 }
 0x170   : > { %v862_v61 = vpop.f32.mrf.mxu1  ;;  %v1085_v30 = vpop.f32.mrf.mxu3 }
 0x171   : > { %v1086_v45 = vadd.f32 %v1085_v30, %v973_v17  ;;  %1601 = vmatmul.f32.vlgmr.msra.gmra.mxu0 %v2485_v54  ;;  %v863_v18 = vadd.f32 %v862_v61, %v2615_v7 }
 0x173   : > { %v3164_v21 = vadd.f32 %v1198_v24, %v1086_v45  ;;  %1265 = vmatmul.f32.gmra.mxu1 %v2471_v43  ;;  %1378 = vmatmul.f32.gmra.mxu2 %v1981_v33  ;;  %v1982_v43 = vld [vmem:[%s2095_s22 + $0x48] sm:$0xff] }
 0x175   : > { %1491 = vmatmul.f32.gmra.mxu3 %v2482_v53 }
 0x176   : > { %v975_v40 = vpop.f32.mrf.mxu2  ;;  %v1201_v41 = vpop.f32.mrf.mxu0 }
 0x177   : > { %v976_v19 = vadd.f32 %v975_v40, %v863_v18 }
 0x178   : > { %v865_v57 = vpop.f32.mrf.mxu1  ;;  %v1088_v31 = vpop.f32.mrf.mxu3 }
 0x179   : > { %v1089_v35 = vadd.f32 %v1088_v31, %v976_v19  ;;  %1604 = vmatmul.f32.gmra.mxu0 %v2507_v3  ;;  %v866_v2 = vadd.f32 %v865_v57, %v2643_v23 }
 0x17b   : > { %v3171_v9 = vadd.f32 %v1201_v41, %v1089_v35  ;;  %1268 = vmatmul.f32.gmra.mxu1 %v2485_v54  ;;  %1381 = vmatmul.f32.gmra.mxu2 %v1982_v43  ;;  %v1983_v54 = vld [vmem:[%s2095_s22 + $0x50] sm:$0xff] }
 0x17d   : > { %1494 = vmatmul.f32.gmra.mxu3 %v2500_v0 }
 0x17e   : > { %v978_v53 = vpop.f32.mrf.mxu2  ;;  %v1204_v7 = vpop.f32.mrf.mxu0 }
 0x17f   : > { %v979_v50 = vadd.f32 %v978_v53, %v866_v2 }
 0x180   : > { %v868_v24 = vpop.f32.mrf.mxu1  ;;  %v1091_v17 = vpop.f32.mrf.mxu3 }
 0x181   : > { %v1092_v61 = vadd.f32 %v1091_v17, %v979_v50  ;;  %1607 = vmatmul.f32.gmra.mxu0 %v2522_v42  ;;  %v869_v45 = vadd.f32 %v868_v24, %v2672_v1 }
 0x183   : > { %v3178_v30 = vadd.f32 %v1204_v7, %v1092_v61  ;;  %1271 = vmatmul.f32.gmra.mxu1 %v2507_v3  ;;  %1384 = vmatmul.f32.gmra.mxu2 %v1983_v54  ;;  %v1984_v3 = vld [vmem:[%s2095_s22 + $0x60] sm:$0xff] }
 0x185   : > { %1497 = vmatmul.f32.gmra.mxu3 %v2519_v26 }
 0x186   : > { %v981_v0 = vpop.f32.mrf.mxu2  ;;  %v1207_v23 = vpop.f32.mrf.mxu0 }
 0x187   : > { %v982_v33 = vadd.f32 %v981_v0, %v869_v45 }
 0x188   : > { %v871_v18 = vpop.f32.mrf.mxu1  ;;  %v1094_v40 = vpop.f32.mrf.mxu3 }
 0x189   : > { %v1095_v41 = vadd.f32 %v1094_v40, %v982_v33  ;;  %1610 = vmatmul.f32.gmra.mxu0 %v2544_v20  ;;  %v872_v57 = vadd.f32 %v871_v18, %v2700_v37 }
 0x18b   : > { %v3185_v19 = vadd.f32 %v1207_v23, %v1095_v41  ;;  %1274 = vmatmul.f32.gmra.mxu1 %v2522_v42  ;;  %1387 = vmatmul.f32.gmra.mxu2 %v1984_v3  ;;  %v1985_v42 = vld [vmem:[%s2095_s22 + $0x68] sm:$0xff] }
 0x18d   : > { %1500 = vmatmul.f32.gmra.mxu3 %v2537_v13 }
 0x18e   : > { %v984_v26 = vpop.f32.mrf.mxu2  ;;  %v1210_v1 = vpop.f32.mrf.mxu0 }
 0x18f   : > { %v985_v31 = vadd.f32 %v984_v26, %v872_v57 }
 0x190   : > { %v874_v35 = vpop.f32.mrf.mxu1  ;;  %v1097_v43 = vpop.f32.mrf.mxu3 }
 0x191   : > { %v1098_v2 = vadd.f32 %v1097_v43, %v985_v31  ;;  %1613 = vmatmul.f32.gmra.mxu0 %v2561_v28  ;;  %v875_v7 = vadd.f32 %v874_v35, %v2729_v11  ;;  %v3620_v35 = vld [vmem:[#allocation6_spill] sm:$0xff] }
 0x193   : > { %v3192_v53 = vadd.f32 %v1210_v1, %v1098_v2  ;;  %1277 = vmatmul.f32.gmra.mxu1 %v2544_v20  ;;  %1390 = vmatmul.f32.gmra.mxu2 %v1985_v42  ;;  %v1986_v20 = vld [vmem:[%s2095_s22 + $0x78] sm:$0xff]  ;;  %v3621_v2 = vld [vmem:[#allocation2_spill] sm:$0xff] }
 0x195   : > { %1503 = vmatmul.f32.gmra.mxu3 %v2556_v25 }
 0x196   : > { %v987_v13 = vpop.f32.mrf.mxu2  ;;  %v1213_v37 = vpop.f32.mrf.mxu0 }
 0x197   : > { %v988_v50 = vadd.f32 %v987_v13, %v875_v7 }
 0x198   : > { %v877_v24 = vpop.f32.mrf.mxu1  ;;  %v1100_v17 = vpop.f32.mrf.mxu3 }
 0x199   : > { %v1101_v61 = vadd.f32 %v1100_v17, %v988_v50  ;;  %1616 = vmatmul.f32.gmra.mxu0 %v2595_v29  ;;  %v878_v45 = vadd.f32 %v877_v24, %v2757_v10  ;;  %v3619_v10 = vld [vmem:[#allocation3_spill] sm:$0xff] }
 0x19b   : > { %v3199_v54 = vadd.f32 %v1213_v37, %v1101_v61  ;;  %1280 = vmatmul.f32.gmra.mxu1 %v2561_v28  ;;  %1393 = vmatmul.f32.gmra.mxu2 %v1986_v20  ;;  %v1987_v28 = vld [vmem:[%s2095_s22 + $0x80] sm:$0xff]  ;;  %v3623_v61 = vld [vmem:[#allocation9_spill] sm:$0xff] }
 0x19d   : > { %1506 = vmatmul.f32.gmra.mxu3 %v2583_v39 }
 0x19e   : > { %v990_v25 = vpop.f32.mrf.mxu2  ;;  %v1216_v11 = vpop.f32.mrf.mxu0 }
 0x19f   : > { %v991_v0 = vadd.f32 %v990_v25, %v878_v45  ;;  %v3624_v45 = vld [vmem:[#allocation4_spill] sm:$0xff] }
 0x1a0   : > { %v880_v23 = vpop.f32.mrf.mxu1  ;;  %v1103_v33 = vpop.f32.mrf.mxu3 }
 0x1a1   : > { %v1104_v18 = vadd.f32 %v1103_v33, %v991_v0  ;;  %1619 = vmatmul.f32.gmra.mxu0 %v2620_v59  ;;  %v881_v41 = vadd.f32 %v880_v23, %v2786_v46  ;;  %v3622_v46 = vld [vmem:[#allocation5_spill] sm:$0xff] }
 0x1a3   : > { %v3206_v40 = vadd.f32 %v1216_v11, %v1104_v18  ;;  %1283 = vmatmul.f32.gmra.mxu1 %v2595_v29  ;;  %1396 = vmatmul.f32.gmra.mxu2 %v1987_v28  ;;  %v1988_v29 = vld [vmem:[%s2095_s22 + $0x90] sm:$0xff] }
 0x1a4   : > { %v3625_v11 = vld [vmem:[#allocation8_spill] sm:$0xff] }
 0x1a5   : > { %1509 = vmatmul.f32.gmra.mxu3 %v3619_v10  ;;  %v3626_v10 = vld [vmem:[#allocation12_spill] sm:$0xff] }
 0x1a6   : > { %v993_v39 = vpop.f32.mrf.mxu2  ;;  %v1219_v3 = vpop.f32.mrf.mxu0 }
 0x1a7   : > { %v994_v57 = vadd.f32 %v993_v39, %v881_v41 }
 0x1a8   : > { %v883_v26 = vpop.f32.mrf.mxu1  ;;  %v1106_v1 = vpop.f32.mrf.mxu3 }
 0x1a9   : > { %v1107_v31 = vadd.f32 %v1106_v1, %v994_v57  ;;  %1622 = vmatmul.f32.gmra.mxu0 %v3620_v35  ;;  %v884_v42 = vadd.f32 %v883_v26, %v3621_v2  ;;  %v3627_v57 = vld [vmem:[#allocation7_spill] sm:$0xff] }
 0x1aa   : > { %v3628_v1 = vld [vmem:[#allocation11_spill] sm:$0xff] }
 0x1ab   : > { %v3213_v43 = vadd.f32 %v1219_v3, %v1107_v31  ;;  %1286 = vmatmul.f32.gmra.mxu1 %v2620_v59  ;;  %1399 = vmatmul.f32.gmra.mxu2 %v1988_v29  ;;  %v1989_v59 = vld [vmem:[%s2095_s22 + $0x98] sm:$0xff]  ;;  %v1990_v3 = vld [vmem:[%s2095_s22 + $0xa8] sm:$0xff] }
 0x1ad   : > { %1512 = vmatmul.f32.gmra.mxu3 %v3622_v46 }
 0x1ae   : > { %v996_v7 = vpop.f32.mrf.mxu2  ;;  %v1222_v13 = vpop.f32.mrf.mxu0 }
 0x1af   : > { %v997_v37 = vadd.f32 %v996_v7, %v884_v42  ;;  %v3629_v7 = vld [vmem:[#allocation15_spill] sm:$0xff] }
 0x1b0   : > { %v886_v50 = vpop.f32.mrf.mxu1  ;;  %v1109_v24 = vpop.f32.mrf.mxu3 }
 0x1b1   : > { %v1110_v17 = vadd.f32 %v1109_v24, %v997_v37  ;;  %1625 = vmatmul.f32.gmra.mxu0 %v3623_v61  ;;  %v887_v25 = vadd.f32 %v886_v50, %v3624_v45  ;;  %v1991_v37 = vld [vmem:[%s2095_s22 + $0xb0] sm:$0xff]  ;;  %v3630_v50 = vld [vmem:[#allocation10_spill] sm:$0xff] }
 0x1b3   : > { %v3220_v20 = vadd.f32 %v1222_v13, %v1110_v17  ;;  %1289 = vmatmul.f32.gmra.mxu1 %v3620_v35  ;;  %1402 = vmatmul.f32.gmra.mxu2 %v1989_v59  ;;  %v3631_v17 = vld [vmem:[#allocation14_spill] sm:$0xff] }
 0x1b5   : > { %1515 = vmatmul.f32.gmra.mxu3 %v3625_v11 }
 0x1b6   : > { %v999_v0 = vpop.f32.mrf.mxu2  ;;  %v1225_v23 = vpop.f32.mrf.mxu0 }
 0x1b7   : > { %v1000_v33 = vadd.f32 %v999_v0, %v887_v25 }
 0x1b8   : > { %v889_v18 = vpop.f32.mrf.mxu1  ;;  %v1112_v28 = vpop.f32.mrf.mxu3 }
 0x1b9   : > { %v1113_v41 = vadd.f32 %v1112_v28, %v1000_v33  ;;  %1628 = vmatmul.f32.gmra.mxu0 %v3626_v10  ;;  %v890_v26 = vadd.f32 %v889_v18, %v3627_v57  ;;  %v1992_v18 = vld [vmem:[%s2095_s22 + $0xc0] sm:$0xff]  ;;  %v3633_v28 = vld [vmem:[#allocation13_spill] sm:$0xff] }
 0x1bb   : > { %v3227_v39 = vadd.f32 %v1225_v23, %v1113_v41  ;;  %1292 = vmatmul.f32.gmra.mxu1 %v3623_v61  ;;  %1405 = vmatmul.f32.gmra.mxu2 %v1990_v3  ;;  %v3632_v23 = vld [vmem:[#allocation18_spill] sm:$0xff] }
 0x1bd   : > { %1518 = vmatmul.f32.gmra.mxu3 %v3628_v1 }
 0x1be   : > { %v1002_v31 = vpop.f32.mrf.mxu2  ;;  %v1228_v35 = vpop.f32.mrf.mxu0 }
 0x1bf   : > { %v1003_v29 = vadd.f32 %v1002_v31, %v890_v26 }
 0x1c0   : > { %v892_v2 = vpop.f32.mrf.mxu1  ;;  %v1115_v42 = vpop.f32.mrf.mxu3 }
 0x1c1   : > { %v1116_v46 = vadd.f32 %v1115_v42, %v1003_v29  ;;  %1631 = vmatmul.f32.gmra.mxu0 %v3629_v7  ;;  %v893_v24 = vadd.f32 %v892_v2, %v3630_v50  ;;  %v3635_v29 = vld [vmem:[#allocation20_spill] sm:$0xff]  ;;  %v1993_v42 = vld [vmem:[%s2095_s22 + $0xc8] sm:$0xff] }
 0x1c3   : > { %v3234_v13 = vadd.f32 %v1228_v35, %v1116_v46  ;;  %1295 = vmatmul.f32.gmra.mxu1 %v3626_v10  ;;  %1408 = vmatmul.f32.gmra.mxu2 %v1991_v37  ;;  %v3634_v10 = vld [vmem:[#allocation17_spill] sm:$0xff]  ;;  %v3636_v46 = vld [vmem:[#allocation16_spill] sm:$0xff] }
 0x1c5   : > { %1521 = vmatmul.f32.gmra.mxu3 %v3631_v17 }
 0x1c6   : > { %v1005_v61 = vpop.f32.mrf.mxu2  ;;  %v1231_v59 = vpop.f32.mrf.mxu0 }
 0x1c7   : > { %v1006_v45 = vadd.f32 %v1005_v61, %v893_v24  ;;  %v2009_v24 = vmov 0.0  }
 0x1c8   : > { %v895_v25 = vpop.f32.mrf.mxu1  ;;  %v1118_v11 = vpop.f32.mrf.mxu3  ;;  %1733 = vst [vmem:[%s3253_s5 + $0x18] sm:$0xff] %v2009_v24 }
 0x1c9   : > { %v1119_v0 = vadd.f32 %v1118_v11, %v1006_v45  ;;  %1634 = vmatmul.f32.gmra.mxu0 %v3632_v23  ;;  %v896_v41 = vadd.f32 %v895_v25, %v3633_v28  ;;  %1734 = vst [vmem:[%s3253_s5 + $0x20] sm:$0xff] %v2009_v24  ;;  %v1994_v25 = vld [vmem:[%s2095_s22 + $0xd8] sm:$0xff]  ;;  %v3637_v11 = vld [vmem:[#allocation19_spill] sm:$0xff] }
 0x1ca   : > { %1730 = vst [vmem:[%s3253_s5] sm:$0xff] %v2009_v24 }
 0x1cb   : > { %v3241_v33 = vadd.f32 %v1231_v59, %v1119_v0  ;;  %1298 = vmatmul.f32.gmra.mxu1 %v3629_v7  ;;  %1411 = vmatmul.f32.gmra.mxu2 %v1992_v18  ;;  %1731 = vst [vmem:[%s3253_s5 + $0x8] sm:$0xff] %v2009_v24 }
 0x1cc   : > { %1732 = vst [vmem:[%s3253_s5 + $0x10] sm:$0x3] %v2009_v24 }
 0x1cd   : > { %1524 = vmatmul.f32.gmra.mxu3 %v3634_v10  ;;  %1735 = vst [vmem:[%s3253_s5 + $0x28] sm:$0x3] %v2009_v24 }
 0x1ce   : > { %v1008_v3 = vpop.f32.mrf.mxu2  ;;  %v1234_v57 = vpop.f32.mrf.mxu0  ;;  %1736 = vst [vmem:[%s3253_s5 + $0x30] sm:$0xff] %v2009_v24 }
 0x1cf   : > { %v1009_v26 = vadd.f32 %v1008_v3, %v896_v41  ;;  %1737 = vst [vmem:[%s3253_s5 + $0x38] sm:$0xff] %v2009_v24 }
 0x1d0   : > { %v898_v1 = vpop.f32.mrf.mxu1  ;;  %v1121_v31 = vpop.f32.mrf.mxu3  ;;  %1738 = vst [vmem:[%s3253_s5 + $0x40] sm:$0x3] %v2009_v24 }
 0x1d1   : > { %v1122_v35 = vadd.f32 %v1121_v31, %v1009_v26  ;;  %1637 = vmatmul.f32.gmra.mxu0 %v3635_v29  ;;  %v899_v7 = vadd.f32 %v898_v1, %v3636_v46  ;;  %1739 = vst [vmem:[%s3253_s5 + $0x48] sm:$0xff] %v2009_v24  ;;  %v3638_v26 = vld [vmem:[#allocation21_spill] sm:$0xff] }
 0x1d2   : > { %1740 = vst [vmem:[%s3253_s5 + $0x50] sm:$0xff] %v2009_v24 }
 0x1d3   : > { %v3255_v2 = vadd.f32 %v1234_v57, %v1122_v35  ;;  %1301 = vmatmul.f32.gmra.mxu1 %v3632_v23  ;;  %1414 = vmatmul.f32.gmra.mxu2 %v1993_v42  ;;  %1741 = vst [vmem:[%s3253_s5 + $0x58] sm:$0x3] %v2009_v24  ;;  %v1995_v57 = vld [vmem:[%s2095_s22 + $0xe0] sm:$0xff] }
 0x1d4   : > { %1742 = vst [vmem:[%s3253_s5 + $0x60] sm:$0xff] %v2009_v24 }
 0x1d5   : > { %1527 = vmatmul.f32.gmra.mxu3 %v2783_v44  ;;  %1743 = vst [vmem:[%s3253_s5 + $0x68] sm:$0xff] %v2009_v24 }
 0x1d6   : > { %v1011_v37 = vpop.f32.mrf.mxu2  ;;  %v1237_v50 = vpop.f32.mrf.mxu0  ;;  %1744 = vst [vmem:[%s3253_s5 + $0x70] sm:$0x3] %v2009_v24 }
 0x1d7   : > { %v1012_v17 = vadd.f32 %v1011_v37, %v899_v7  ;;  %1745 = vst [vmem:[%s3253_s5 + $0x78] sm:$0xff] %v2009_v24  ;;  %v1996_v7 = vld [vmem:[%s2095_s22 + $0xf0] sm:$0xff]  ;;  %v3639_v37 = vld [vmem:[#allocation22_spill] sm:$0xff] }
 0x1d8   : > { %v901_v61 = vpop.f32.mrf.mxu1  ;;  %v1124_v59 = vpop.f32.mrf.mxu3  ;;  %1746 = vst [vmem:[%s3253_s5 + $0x80] sm:$0xff] %v2009_v24 }
 0x1d9   : > { %v1125_v45 = vadd.f32 %v1124_v59, %v1012_v17  ;;  %1640 = vmatmul.f32.gmra.mxu0 %v2816_v14  ;;  %v902_v0 = vadd.f32 %v901_v61, %v3637_v11  ;;  %1747 = vst [vmem:[%s3253_s5 + $0x88] sm:$0x3] %v2009_v24  ;;  %v1997_v11 = vld [vmem:[%s2095_s22 + $0xf8] sm:$0xff] }
 0x1da   : > { %1748 = vst [vmem:[%s3253_s5 + $0x90] sm:$0xff] %v2009_v24 }
 0x1db   : > { %v3272_v44 = vadd.f32 %v1237_v50, %v1125_v45  ;;  %1304 = vmatmul.f32.gmra.mxu1 %v3635_v29  ;;  %1417 = vmatmul.f32.gmra.mxu2 %v1994_v25  ;;  %1749 = vst [vmem:[%s3253_s5 + $0x98] sm:$0xff] %v2009_v24 }
 0x1dc   : > { %1750 = vst [vmem:[%s3253_s5 + $0xa0] sm:$0x3] %v2009_v24 }
 0x1dd   : > { %1530 = vmatmul.f32.gmra.mxu3 %v2809_v38  ;;  %1751 = vst [vmem:[%s3253_s5 + $0xa8] sm:$0xff] %v2009_v24 }
 0x1de   : > { %v1014_v23 = vpop.f32.mrf.mxu2  ;;  %v1240_v18 = vpop.f32.mrf.mxu0  ;;  %1752 = vst [vmem:[%s3253_s5 + $0xb0] sm:$0xff] %v2009_v24 }
 0x1df   : > { %v1015_v28 = vadd.f32 %v1014_v23, %v902_v0  ;;  %1753 = vst [vmem:[%s3253_s5 + $0xb8] sm:$0x3] %v2009_v24 }
 0x1e0   : > { %v904_v41 = vpop.f32.mrf.mxu1  ;;  %v1127_v10 = vpop.f32.mrf.mxu3  ;;  %1754 = vst [vmem:[%s3253_s5 + $0xc0] sm:$0xff] %v2009_v24 }
 0x1e1   : > { %v1128_v3 = vadd.f32 %v1127_v10, %v1015_v28  ;;  %1643 = vmatmul.f32.gmra.mxu0 %v2835_v47  ;;  %v905_v1 = vadd.f32 %v904_v41, %v3638_v26  ;;  %1755 = vst [vmem:[%s3253_s5 + $0xc8] sm:$0xff] %v2009_v24  ;;  %v3640_v41 = vld [vmem:[#allocation26_spill] sm:$0xff]  ;;  %v3642_v26 = vld [vmem:[#allocation24_spill] sm:$0xff] }
 0x1e2   : > { %1756 = vst [vmem:[%s3253_s5 + $0xd0] sm:$0x3] %v2009_v24 }
 0x1e3   : > { %v3295_v38 = vadd.f32 %v1240_v18, %v1128_v3  ;;  %1307 = vmatmul.f32.gmra.mxu1 %v2816_v14  ;;  %1420 = vmatmul.f32.gmra.mxu2 %v1995_v57  ;;  %1757 = vst [vmem:[%s3253_s5 + $0xd8] sm:$0xff] %v2009_v24  ;;  %v1998_v3 = vld [vmem:[%s2095_s22 + $0x108] sm:$0xff] }
 0x1e4   : > { %1758 = vst [vmem:[%s3253_s5 + $0xe0] sm:$0xff] %v2009_v24 }
 0x1e5   : > { %1533 = vmatmul.f32.gmra.mxu3 %v2832_v55  ;;  %1759 = vst [vmem:[%s3253_s5 + $0xe8] sm:$0x3] %v2009_v24 }
 0x1e6   : > { %v1017_v31 = vpop.f32.mrf.mxu2  ;;  %v1243_v35 = vpop.f32.mrf.mxu0  ;;  %1760 = vst [vmem:[%s3253_s5 + $0xf0] sm:$0xff] %v2009_v24 }
 0x1e7   : > { %v1018_v14 = vadd.f32 %v1017_v31, %v905_v1  ;;  %1761 = vst [vmem:[%s3253_s5 + $0xf8] sm:$0xff] %v2009_v24 }
 0x1e8   : > { %v1130_v29 = vpop.f32.mrf.mxu3  ;;  %v1263_v42 = vpop.f32.mrf.mxu1  ;;  %1762 = vst [vmem:[%s3253_s5 + $0x100] sm:$0x3] %v2009_v24 }
 0x1e9   : > { %v1131_v46 = vadd.f32 %v1130_v29, %v1018_v14  ;;  %1646 = vmatmul.f32.gmra.mxu0 %v2861_v22  ;;  %v1264_v50 = vadd.f32 %v1263_v42, %v3639_v37  ;;  %1763 = vst [vmem:[%s3253_s5 + $0x108] sm:$0xff] %v2009_v24 }
 0x1ea   : > { %1764 = vst [vmem:[%s3253_s5 + $0x110] sm:$0xff] %v2009_v24 }
 0x1eb   : > { %v3318_v55 = vadd.f32 %v1243_v35, %v1131_v46  ;;  %1310 = vmatmul.f32.gmra.mxu1 %v2835_v47  ;;  %1423 = vmatmul.f32.gmra.mxu2 %v1996_v7  ;;  %1765 = vst [vmem:[%s3253_s5 + $0x118] sm:$0x3] %v2009_v24  ;;  %v3643_v46 = vld [vmem:[#allocation28_spill] sm:$0xff] }
 0x1ec   : > { %1766 = vst [vmem:[%s3253_s5 + $0x120] sm:$0xff] %v2009_v24  ;;  %v1999_v7 = vld [vmem:[%s2095_s22 + $0x110] sm:$0xff] }
 0x1ed   : > { %1536 = vmatmul.f32.gmra.mxu3 %v2854_v62  ;;  %1767 = vst [vmem:[%s3253_s5 + $0x128] sm:$0xff] %v2009_v24 }
 0x1ee   : > { %v1376_v17 = vpop.f32.mrf.mxu2  ;;  %v1602_v61 = vpop.f32.mrf.mxu0  ;;  %1768 = vst [vmem:[%s3253_s5 + $0x130] sm:$0x3] %v2009_v24 }
 0x1ef   : > { %v1377_v47 = vadd.f32 %v1376_v17, %v1264_v50  ;;  %1769 = vst [vmem:[%s3253_s5 + $0x138] sm:$0xff] %v2009_v24  ;;  %v3644_v50 = vld [vmem:[#allocation25_spill] sm:$0xff] }
 0x1f0   : > { %v1266_v59 = vpop.f32.mrf.mxu1  ;;  %v1489_v45 = vpop.f32.mrf.mxu3  ;;  %1770 = vst [vmem:[%s3253_s5 + $0x140] sm:$0xff] %v2009_v24 }
 0x1f1   : > { %v1490_v25 = vadd.f32 %v1489_v45, %v1377_v47  ;;  %1649 = vmatmul.f32.gmra.mxu0 %v2880_v15  ;;  %1771 = vst [vmem:[%s3253_s5 + $0x148] sm:$0x3] %v2009_v24 }
 0x1f2   : > { %1772 = vst [vmem:[%s3253_s5 + $0x150] sm:$0xff] %v2009_v24 }
 0x1f3   : > { %v1603_v62 = vadd.f32 %v1602_v61, %v1490_v25  ;;  %1313 = vmatmul.f32.gmra.mxu1 %v2861_v22  ;;  %1426 = vmatmul.f32.gmra.mxu2 %v1997_v11  ;;  %1773 = vst [vmem:[%s3253_s5 + $0x158] sm:$0xff] %v2009_v24 }
 0x1f4   : > { %1774 = vst [vmem:[%s3253_s5 + $0x160] sm:$0x3] %v2009_v24 }
 0x1f5   : > { %v1698_v0 = vmax.f32 %v1603_v62, 0.0  ;;  %1539 = vmatmul.f32.gmra.mxu3 %v2877_v56  ;;  %v3641_v56 = vld [vmem:[#allocation23_spill] sm:$0xff]  ;;  %1775 = vst [vmem:[%s3253_s5 + $0x168] sm:$0xff] %v2009_v24 }
 0x1f6   : > { %v1379_v23 = vpop.f32.mrf.mxu2  ;;  %v1605_v18 = vpop.f32.mrf.mxu0  ;;  %v1267_v10 = vadd.f32 %v1266_v59, %v3641_v56  ;;  %1776 = vst [vmem:[%s3253_s5 + $0x170] sm:$0xff] %v2009_v24 }
 0x1f7   : > { %1879 = vst [vmem:[%s3253_s5 + $0x19] sm:$0xff] %v1698_v0  ;;  %v3645_v0 = vld [vmem:[#allocation31_spill] sm:$0xff] }
 0x1f8   : > { %v1269_v22 = vpop.f32.mrf.mxu1  ;;  %v1492_v28 = vpop.f32.mrf.mxu3  ;;  %v1380_v57 = vadd.f32 %v1379_v23, %v1267_v10  ;;  %1777 = vst [vmem:[%s3253_s5 + $0x178] sm:$0x3] %v2009_v24 }
 0x1f9   : > { %1652 = vmatmul.f32.gmra.mxu0 %v3640_v41  ;;  %v1270_v1 = vadd.f32 %v1269_v22, %v3642_v26  ;;  %1778 = vst [vmem:[%s3253_s5 + $0x180] sm:$0xff] %v2009_v24  ;;  %v3646_v22 = vld [vmem:[#allocation29_spill] sm:$0xff] }
 0x1fa   : > { %v1493_v42 = vadd.f32 %v1492_v28, %v1380_v57  ;;  %1779 = vst [vmem:[%s3253_s5 + $0x188] sm:$0xff] %v2009_v24  ;;  %v3647_v28 = vld [vmem:[#allocation27_spill] sm:$0xff] }
 0x1fb   : > { %1316 = vmatmul.f32.gmra.mxu1 %v2880_v15  ;;  %1429 = vmatmul.f32.gmra.mxu2 %v1998_v3  ;;  %1780 = vst [vmem:[%s3253_s5 + $0x190] sm:$0x3] %v2009_v24 }
 0x1fc   : > { %v1606_v37 = vadd.f32 %v1605_v18, %v1493_v42  ;;  %1781 = vst [vmem:[%s3253_s5 + $0x198] sm:$0xff] %v2009_v24 }
 0x1fd   : > { %1542 = vmatmul.f32.gmra.mxu3 %v2899_v32  ;;  %1782 = vst [vmem:[%s3253_s5 + $0x1a0] sm:$0xff] %v2009_v24 }
 0x1fe   : > { %v1382_v31 = vpop.f32.mrf.mxu2  ;;  %v1608_v15 = vpop.f32.mrf.mxu0  ;;  %v1699_v11 = vmax.f32 %v1606_v37, 0.0  ;;  %1783 = vst [vmem:[%s3253_s5 + $0x1a8] sm:$0x3] %v2009_v24  ;;  %v2000_v24 = vld [vmem:[%s2095_s22 + $0x128] sm:$0xff] }
 0x1ff   : > { %v1383_v35 = vadd.f32 %v1382_v31, %v1270_v1 }
 0x200   : > { %v1272_v14 = vpop.f32.mrf.mxu1  ;;  %v1495_v29 = vpop.f32.mrf.mxu3  ;;  %1880 = vst [vmem:[%s3253_s5 + $0x21] sm:$0xff] %v1699_v11  ;;  %v3654_v11 = vld [vmem:[#allocation38_spill] sm:$0xff] }
 0x201   : > { %1655 = vmatmul.f32.gmra.mxu0 %v3643_v46  ;;  %v1496_v32 = vadd.f32 %v1495_v29, %v1383_v35  ;;  %v1273_v17 = vadd.f32 %v1272_v14, %v3644_v50  ;;  %v3649_v14 = vld [vmem:[#allocation30_spill] sm:$0xff] }
 0x203   : > { %1319 = vmatmul.f32.gmra.mxu1 %v3640_v41  ;;  %1432 = vmatmul.f32.gmra.mxu2 %v1999_v7  ;;  %v1609_v61 = vadd.f32 %v1608_v15, %v1496_v32  ;;  %v3648_v15 = vld [vmem:[#allocation34_spill] sm:$0xff] }
 0x205   : > { %1545 = vmatmul.f32.gmra.mxu3 %v2922_v60  ;;  %v1700_v23 = vmax.f32 %v1609_v61, 0.0  ;;  %v3651_v61 = vld [vmem:[#allocation39_spill] sm:$0xff] }
 0x206   : > { %v1385_v47 = vpop.f32.mrf.mxu2  ;;  %v1611_v59 = vpop.f32.mrf.mxu0 }
 0x207   : > { %v1386_v45 = vadd.f32 %v1385_v47, %v1273_v17  ;;  %1881 = vst [vmem:[%s3253_s5 + $0x31] sm:$0xff] %v1700_v23 }
 0x208   : > { %v1275_v25 = vpop.f32.mrf.mxu1  ;;  %v1498_v62 = vpop.f32.mrf.mxu3 }
 0x209   : > { %v1499_v60 = vadd.f32 %v1498_v62, %v1386_v45  ;;  %1658 = vmatmul.f32.gmra.mxu0 %v3645_v0  ;;  %v1276_v41 = vadd.f32 %v1275_v25, %v3647_v28  ;;  %v3653_v45 = vld [vmem:[#allocation32_spill] sm:$0xff] }
 0x20b   : > { %v1612_v18 = vadd.f32 %v1611_v59, %v1499_v60  ;;  %1322 = vmatmul.f32.gmra.mxu1 %v3643_v46  ;;  %1435 = vmatmul.f32.gmra.mxu2 %v3646_v22  ;;  %v3652_v59 = vld [vmem:[#allocation35_spill] sm:$0xff] }
 0x20d   : > { %v1701_v56 = vmax.f32 %v1612_v18, 0.0  ;;  %1548 = vmatmul.f32.gmra.mxu3 %v2950_v49  ;;  %v3650_v49 = vld [vmem:[#allocation33_spill] sm:$0xff] }
 0x20e   : > { %v1388_v10 = vpop.f32.mrf.mxu2  ;;  %v1614_v3 = vpop.f32.mrf.mxu0 }
 0x20f   : > { %1882 = vst [vmem:[%s3253_s5 + $0x39] sm:$0xff] %v1701_v56  ;;  %v1389_v57 = vadd.f32 %v1388_v10, %v1276_v41  ;;  %v3655_v41 = vld [vmem:[#allocation42_spill] sm:$0xff]  ;;  %v3656_v10 = vld [vmem:[#allocation36_spill] sm:$0xff] }
 0x210   : > { %v1278_v26 = vpop.f32.mrf.mxu1  ;;  %v1501_v1 = vpop.f32.mrf.mxu3 }
 0x211   : > { %v1502_v31 = vadd.f32 %v1501_v1, %v1389_v57  ;;  %1661 = vmatmul.f32.gmra.mxu0 %v3648_v15  ;;  %v1279_v29 = vadd.f32 %v1278_v26, %v3649_v14  ;;  %v3658_v1 = vld [vmem:[#allocation41_spill] sm:$0xff] }
 0x213   : > { %v1615_v35 = vadd.f32 %v1614_v3, %v1502_v31  ;;  %1325 = vmatmul.f32.gmra.mxu1 %v3645_v0  ;;  %1438 = vmatmul.f32.gmra.mxu2 %v2000_v24  ;;  %v3657_v3 = vld [vmem:[#allocation37_spill] sm:$0xff] }
 0x215   : > { %v1702_v42 = vmax.f32 %v1615_v35, 0.0  ;;  %1551 = vmatmul.f32.gmra.mxu3 %v3650_v49 }
 0x216   : > { %v1391_v46 = vpop.f32.mrf.mxu2  ;;  %v1617_v32 = vpop.f32.mrf.mxu0 }
 0x217   : > { %1883 = vst [vmem:[%s3253_s5 + $0x49] sm:$0xff] %v1702_v42  ;;  %v1392_v7 = vadd.f32 %v1391_v46, %v1279_v29  ;;  %v3659_v42 = vld [vmem:[#allocation46_spill] sm:$0xff]  ;;  %v3660_v46 = vld [vmem:[#allocation43_spill] sm:$0xff] }
 0x218   : > { %v1281_v37 = vpop.f32.mrf.mxu1  ;;  %v1504_v50 = vpop.f32.mrf.mxu3 }
 0x219   : > { %v1505_v17 = vadd.f32 %v1504_v50, %v1392_v7  ;;  %1664 = vmatmul.f32.gmra.mxu0 %v3651_v61  ;;  %v1282_v25 = vadd.f32 %v1281_v37, %v3653_v45 }
 0x21b   : > { %v1618_v47 = vadd.f32 %v1617_v32, %v1505_v17  ;;  %1328 = vmatmul.f32.gmra.mxu1 %v3648_v15  ;;  %1441 = vmatmul.f32.gmra.mxu2 %v3652_v59  ;;  %v3661_v32 = vld [vmem:[#allocation40_spill] sm:$0xff] }
 0x21d   : > { %v1703_v62 = vmax.f32 %v1618_v47, 0.0  ;;  %1554 = vmatmul.f32.gmra.mxu3 %v3654_v11  ;;  %v3663_v11 = vld [vmem:[#allocation45_spill] sm:$0xff] }
 0x21e   : > { %v1394_v60 = vpop.f32.mrf.mxu2  ;;  %v1620_v0 = vpop.f32.mrf.mxu0 }
 0x21f   : > { %1884 = vst [vmem:[%s3253_s5 + $0x51] sm:$0xff] %v1703_v62  ;;  %v1395_v23 = vadd.f32 %v1394_v60, %v1282_v25  ;;  %v3662_v62 = vld [vmem:[#allocation44_spill] sm:$0xff] }
 0x220   : > { %v1284_v18 = vpop.f32.mrf.mxu1  ;;  %v1507_v22 = vpop.f32.mrf.mxu3 }
 0x221   : > { %v1508_v28 = vadd.f32 %v1507_v22, %v1395_v23  ;;  %1667 = vmatmul.f32.gmra.mxu0 %v3655_v41  ;;  %v1285_v57 = vadd.f32 %v1284_v18, %v3657_v3  ;;  %v3665_v3 = vld [vmem:[#allocation48_spill] sm:$0xff] }
 0x223   : > { %v1621_v56 = vadd.f32 %v1620_v0, %v1508_v28  ;;  %1331 = vmatmul.f32.gmra.mxu1 %v3651_v61  ;;  %1444 = vmatmul.f32.gmra.mxu2 %v3656_v10 }
 0x225   : > { %v1704_v26 = vmax.f32 %v1621_v56, 0.0  ;;  %1557 = vmatmul.f32.gmra.mxu3 %v3658_v1  ;;  %v3664_v56 = vld [vmem:[#allocation51_spill] sm:$0xff] }
 0x226   : > { %v1397_v31 = vpop.f32.mrf.mxu2  ;;  %v1623_v15 = vpop.f32.mrf.mxu0 }
 0x227   : > { %1885 = vst [vmem:[%s3253_s5 + $0x61] sm:$0xff] %v1704_v26  ;;  %v1398_v35 = vadd.f32 %v1397_v31, %v1285_v57  ;;  %v3666_v57 = vld [vmem:[#allocation47_spill] sm:$0xff] }
 0x228   : > { %v1287_v24 = vpop.f32.mrf.mxu1  ;;  %v1510_v14 = vpop.f32.mrf.mxu3 }
 0x229   : > { %v1511_v29 = vadd.f32 %v1510_v14, %v1398_v35  ;;  %1670 = vmatmul.f32.gmra.mxu0 %v3659_v42  ;;  %v1288_v7 = vadd.f32 %v1287_v24, %v3661_v32 }
 0x22b   : > { %v1624_v49 = vadd.f32 %v1623_v15, %v1511_v29  ;;  %1334 = vmatmul.f32.gmra.mxu1 %v3655_v41  ;;  %1447 = vmatmul.f32.gmra.mxu2 %v3660_v46 }
 0x22d   : > { %v1705_v37 = vmax.f32 %v1624_v49, 0.0  ;;  %1560 = vmatmul.f32.gmra.mxu3 %v3052_v52 }
 0x22e   : > { %v1400_v50 = vpop.f32.mrf.mxu2  ;;  %v1626_v17 = vpop.f32.mrf.mxu0 }
 0x22f   : > { %1886 = vst [vmem:[%s3253_s5 + $0x69] sm:$0xff] %v1705_v37  ;;  %v1401_v61 = vadd.f32 %v1400_v50, %v1288_v7 }
 0x230   : > { %v1290_v47 = vpop.f32.mrf.mxu1  ;;  %v1513_v59 = vpop.f32.mrf.mxu3 }
 0x231   : > { %v1514_v45 = vadd.f32 %v1513_v59, %v1401_v61  ;;  %1673 = vmatmul.f32.gmra.mxu0 %v3078_v48  ;;  %v1291_v60 = vadd.f32 %v1290_v47, %v3663_v11  ;;  %v509_v61 = vrot.slane %v3123_v12, 2  ;;  %v510_v47 = vrot.slane %v3117_v8, 2 }
 0x233   : > { %v1627_v25 = vadd.f32 %v1626_v17, %v1514_v45  ;;  %1337 = vmatmul.f32.gmra.mxu1 %v3659_v42  ;;  %1450 = vmatmul.f32.gmra.mxu2 %v3662_v62  ;;  %v3668_v42 = vld [vmem:[#allocation50_spill] sm:$0xff] }
 0x235   : > { %v1706_v0 = vmax.f32 %v1627_v25, 0.0  ;;  %1563 = vmatmul.f32.gmra.mxu3 %v3075_v36 }
 0x236   : > { %v1403_v52 = vpop.f32.mrf.mxu2  ;;  %v1629_v23 = vpop.f32.mrf.mxu0 }
 0x237   : > { %1887 = vst [vmem:[%s3253_s5 + $0x79] sm:$0xff] %v1706_v0  ;;  %v1404_v18 = vadd.f32 %v1403_v52, %v1291_v60  ;;  %v511_v60 = vsel %vm386_vm1, %v509_v61, %v510_v47 }
 0x238   : > { %v1293_v22 = vpop.f32.mrf.mxu1  ;;  %v1516_v28 = vpop.f32.mrf.mxu3 }
 0x239   : > { %v1517_v41 = vadd.f32 %v1516_v28, %v1404_v18  ;;  %1676 = vmatmul.f32.gmra.mxu0 %v3664_v56  ;;  %v1294_v26 = vadd.f32 %v1293_v22, %v3666_v57  ;;  %v222_v22 = vld [vmem:[%s2095_s22 + $0x198] sm:$0xff] }
 0x23a   : > { %v3670_v28 = vld [vmem:[#allocation53_spill] sm:$0xff]  ;;  %v519_v57 = vrot.slane %v222_v22, 1 }
 0x23b   : > { %v1630_v10 = vadd.f32 %v1629_v23, %v1517_v41  ;;  %1340 = vmatmul.f32.gmra.mxu1 %v3078_v48  ;;  %1453 = vmatmul.f32.gmra.mxu2 %v3665_v3  ;;  %v3667_v48 = vld [vmem:[#allocation49_spill] sm:$0xff] }
 0x23d   : > { %v1707_v1 = vmax.f32 %v1630_v10, 0.0  ;;  %1566 = vmatmul.f32.gmra.mxu3 %v3097_v5 }
 0x23e   : > { %v1406_v36 = vpop.f32.mrf.mxu2  ;;  %v1632_v31 = vpop.f32.mrf.mxu0 }
 0x23f   : > { %1888 = vst [vmem:[%s3253_s5 + $0x81] sm:$0xff] %v1707_v1  ;;  %v1407_v15 = vadd.f32 %v1406_v36, %v1294_v26 }
 0x240   : > { %v1296_v35 = vpop.f32.mrf.mxu1  ;;  %v1519_v24 = vpop.f32.mrf.mxu3 }
 0x241   : > { %v1520_v14 = vadd.f32 %v1519_v24, %v1407_v15  ;;  %1679 = vmatmul.f32.gmra.mxu0 %v3120_v16  ;;  %v1297_v49 = vadd.f32 %v1296_v35, %v3668_v42 }
 0x243   : > { %v1633_v29 = vadd.f32 %v1632_v31, %v1520_v14  ;;  %1343 = vmatmul.f32.gmra.mxu1 %v3664_v56  ;;  %1456 = vmatmul.f32.gmra.mxu2 %v3667_v48 }
 0x245   : > { %v1708_v46 = vmax.f32 %v1633_v29, 0.0  ;;  %1569 = vmatmul.f32.gmra.mxu3 %v3114_v27  ;;  %v3669_v27 = vld [vmem:[#allocation52_spill] sm:$0xff] }
 0x246   : > { %v1409_v5 = vpop.f32.mrf.mxu2  ;;  %v1635_v32 = vpop.f32.mrf.mxu0 }
 0x247   : > { %1889 = vst [vmem:[%s3253_s5 + $0x91] sm:$0xff] %v1708_v46  ;;  %v1410_v7 = vadd.f32 %v1409_v5, %v1297_v49 }
 0x248   : > { %v1299_v37 = vpop.f32.mrf.mxu1  ;;  %v1522_v50 = vpop.f32.mrf.mxu3 }
 0x249   : > { %v1523_v17 = vadd.f32 %v1522_v50, %v1410_v7  ;;  %1682 = vmatmul.f32.gmra.mxu0 %v3142_v34  ;;  %v1300_v45 = vadd.f32 %v1299_v37, %v3669_v27 }
 0x24b   : > { %v1636_v59 = vadd.f32 %v1635_v32, %v1523_v17  ;;  %1346 = vmatmul.f32.gmra.mxu1 %v3120_v16  ;;  %1459 = vmatmul.f32.gmra.mxu2 %v3123_v12  ;;  %v512_v12 = vrot.slane %v3139_v51, 2 }
 0x24d   : > { %v1709_v25 = vmax.f32 %v1636_v59, 0.0  ;;  %1572 = vmatmul.f32.gmra.mxu3 %v3136_v4  ;;  %v223_v4 = vld [vmem:[%s2095_s22 + $0x1a0] sm:$0xff]  ;;  %v513_v1 = vsel %vm386_vm1, %v510_v47, %v512_v12 }
 0x24e   : > { %v1412_v62 = vpop.f32.mrf.mxu2  ;;  %v1638_v11 = vpop.f32.mrf.mxu0  ;;  %v520_v26 = vrot.slane %v223_v4, 1  ;;  %v527_v35 = vrot.slane %v223_v4, 2 }
 0x24f   : > { %1890 = vst [vmem:[%s3253_s5 + $0x99] sm:$0xff] %v1709_v25  ;;  %v1413_v0 = vadd.f32 %v1412_v62, %v1300_v45 }
 0x250   : > { %v1302_v52 = vpop.f32.mrf.mxu1  ;;  %v1525_v23 = vpop.f32.mrf.mxu3  ;;  %v521_v15 = vsel %vm273_vm0, %v519_v57, %v520_v26 }
 0x251   : > { %v1526_v18 = vadd.f32 %v1525_v23, %v1413_v0  ;;  %1685 = vmatmul.f32.gmra.mxu0 %v511_v60  ;;  %v1303_v41 = vadd.f32 %v1302_v52, %v3670_v28 }
 0x253   : > { %v1639_v16 = vadd.f32 %v1638_v11, %v1526_v18  ;;  %1349 = vmatmul.f32.gmra.mxu1 %v3142_v34  ;;  %1462 = vmatmul.f32.gmra.mxu2 %v3117_v8  ;;  %v526_v8 = vrot.slane %v222_v22, 2 }
 0x255   : > { %v1710_v56 = vmax.f32 %v1639_v16, 0.0  ;;  %1575 = vmatmul.f32.gmra.mxu3 %v3154_v6  ;;  %v224_v6 = vld [vmem:[%s2095_s22 + $0x1a8] sm:$0x3]  ;;  %v528_v46 = vsel %vm386_vm1, %v526_v8, %v527_v35 }
 0x256   : > { %v1415_v10 = vpop.f32.mrf.mxu2  ;;  %v1641_v3 = vpop.f32.mrf.mxu0  ;;  %v522_v49 = vrot.slane %v224_v6, 1  ;;  %v529_v17 = vrot.slane %v224_v6, 2 }
 0x257   : > { %1891 = vst [vmem:[%s3253_s5 + $0xa9] sm:$0xff] %v1710_v56  ;;  %v1416_v51 = vadd.f32 %v1415_v10, %v1303_v41 }
 0x258   : > { %v1305_v36 = vpop.f32.mrf.mxu1  ;;  %v1528_v34 = vpop.f32.mrf.mxu3  ;;  %v523_v50 = vsel %vm273_vm0, %v520_v26, %v522_v49  ;;  %v530_v45 = vsel %vm386_vm1, %v527_v35, %v529_v17 }
 0x259   : > { %v1529_v31 = vadd.f32 %v1528_v34, %v1416_v51  ;;  %1688 = vmatmul.f32.gmra.mxu0 %v513_v1  ;;  %v1306_v14 = vadd.f32 %v1305_v36, %v3148_v63 }
 0x25b   : > { %v1642_v24 = vadd.f32 %v1641_v3, %v1529_v31  ;;  %1352 = vmatmul.f32.gmra.mxu1 %v511_v60  ;;  %1465 = vmatmul.f32.gmra.mxu2 %v222_v22 }
 0x25d   : > { %v1711_v29 = vmax.f32 %v1642_v24, 0.0  ;;  %1578 = vmatmul.f32.gmra.mxu3 %v521_v15 }
 0x25e   : > { %v1418_v48 = vpop.f32.mrf.mxu2  ;;  %v1644_v42 = vpop.f32.mrf.mxu0 }
 0x25f   : > { %1892 = vst [vmem:[%s3253_s5 + $0xb1] sm:$0xff] %v1711_v29  ;;  %v1419_v5 = vadd.f32 %v1418_v48, %v1306_v14 }
 0x260   : > { %v1308_v32 = vpop.f32.mrf.mxu1  ;;  %v1531_v7 = vpop.f32.mrf.mxu3 }
 0x261   : > { %v1532_v37 = vadd.f32 %v1531_v7, %v1419_v5  ;;  %1691 = vmatmul.f32.gmra.mxu0 %v528_v46  ;;  %v1309_v63 = vadd.f32 %v1308_v32, %v3157_v58 }
 0x263   : > { %v1645_v61 = vadd.f32 %v1644_v42, %v1532_v37  ;;  %1355 = vmatmul.f32.gmra.mxu1 %v513_v1  ;;  %1468 = vmatmul.f32.gmra.mxu2 %v223_v4 }
 0x265   : > { %v1712_v47 = vmax.f32 %v1645_v61, 0.0  ;;  %1581 = vmatmul.f32.gmra.mxu3 %v523_v50 }
 0x266   : > { %v1421_v59 = vpop.f32.mrf.mxu2  ;;  %v1647_v27 = vpop.f32.mrf.mxu0 }
 0x267   : > { %1893 = vst [vmem:[%s3253_s5 + $0xc1] sm:$0xff] %v1712_v47  ;;  %v1422_v25 = vadd.f32 %v1421_v59, %v1309_v63 }
 0x268   : > { %v1311_v62 = vpop.f32.mrf.mxu1  ;;  %v1534_v11 = vpop.f32.mrf.mxu3 }
 0x269   : > { %v1535_v60 = vadd.f32 %v1534_v11, %v1422_v25  ;;  %1694 = vmatmul.f32.gmra.mxu0 %v530_v45  ;;  %v1312_v52 = vadd.f32 %v1311_v62, %v3164_v21 }
 0x26b   : > { %v1648_v0 = vadd.f32 %v1647_v27, %v1535_v60 }
 0x26d   : > { %v1713_v23 = vmax.f32 %v1648_v0, 0.0 }
 0x26e   : > { %v1424_v18 = vpop.f32.mrf.mxu2  ;;  %v1650_v58 = vpop.f32.mrf.mxu0 }
 0x26f   : > { %1894 = vst [vmem:[%s3253_s5 + $0xc9] sm:$0xff] %v1713_v23  ;;  %v1425_v12 = vadd.f32 %v1424_v18, %v1312_v52 }
 0x270   : > { %v1314_v16 = vpop.f32.mrf.mxu1  ;;  %v1537_v22 = vpop.f32.mrf.mxu3 }
 0x271   : > { %v1538_v4 = vadd.f32 %v1537_v22, %v1425_v12  ;;  %v1315_v41 = vadd.f32 %v1314_v16, %v3171_v9 }
 0x273   : > { %v1651_v28 = vadd.f32 %v1650_v58, %v1538_v4 }
 0x275   : > { %v1714_v56 = vmax.f32 %v1651_v28, 0.0 }
 0x276   : > { %v1427_v10 = vpop.f32.mrf.mxu2  ;;  %v1653_v3 = vpop.f32.mrf.mxu0 }
 0x277   : > { %1895 = vst [vmem:[%s3253_s5 + $0xd9] sm:$0xff] %v1714_v56  ;;  %v1428_v57 = vadd.f32 %v1427_v10, %v1315_v41 }
 0x278   : > { %v1317_v26 = vpop.f32.mrf.mxu1  ;;  %v1540_v1 = vpop.f32.mrf.mxu3 }
 0x279   : > { %v1541_v21 = vadd.f32 %v1540_v1, %v1428_v57  ;;  %v1318_v36 = vadd.f32 %v1317_v26, %v3178_v30 }
 0x27b   : > { %v1654_v51 = vadd.f32 %v1653_v3, %v1541_v21 }
 0x27d   : > { %v1715_v34 = vmax.f32 %v1654_v51, 0.0 }
 0x27e   : > { %v1430_v31 = vpop.f32.mrf.mxu2  ;;  %v1656_v8 = vpop.f32.mrf.mxu0 }
 0x27f   : > { %1896 = vst [vmem:[%s3253_s5 + $0xe1] sm:$0xff] %v1715_v34  ;;  %v1431_v15 = vadd.f32 %v1430_v31, %v1318_v36 }
 0x280   : > { %v1320_v35 = vpop.f32.mrf.mxu1  ;;  %v1543_v24 = vpop.f32.mrf.mxu3 }
 0x281   : > { %v1544_v9 = vadd.f32 %v1543_v24, %v1431_v15  ;;  %v1321_v14 = vadd.f32 %v1320_v35, %v3185_v19 }
 0x283   : > { %v1657_v6 = vadd.f32 %v1656_v8, %v1544_v9 }
 0x285   : > { %v1716_v29 = vmax.f32 %v1657_v6, 0.0 }
 0x286   : > { %v1433_v48 = vpop.f32.mrf.mxu2  ;;  %v1659_v42 = vpop.f32.mrf.mxu0 }
 0x287   : > { %1897 = vst [vmem:[%s3253_s5 + $0xf1] sm:$0xff] %v1716_v29  ;;  %v1434_v49 = vadd.f32 %v1433_v48, %v1321_v14 }
 0x288   : > { %v1323_v46 = vpop.f32.mrf.mxu1  ;;  %v1546_v5 = vpop.f32.mrf.mxu3 }
 0x289   : > { %v1547_v30 = vadd.f32 %v1546_v5, %v1434_v49  ;;  %v1324_v7 = vadd.f32 %v1323_v46, %v3192_v53 }
 0x28b   : > { %v1660_v32 = vadd.f32 %v1659_v42, %v1547_v30 }
 0x28d   : > { %v1717_v37 = vmax.f32 %v1660_v32, 0.0 }
 0x28e   : > { %v1436_v50 = vpop.f32.mrf.mxu2  ;;  %v1662_v17 = vpop.f32.mrf.mxu0 }
 0x28f   : > { %1898 = vst [vmem:[%s3253_s5 + $0xf9] sm:$0xff] %v1717_v37  ;;  %v1437_v61 = vadd.f32 %v1436_v50, %v1324_v7 }
 0x290   : > { %v1326_v63 = vpop.f32.mrf.mxu1  ;;  %v1549_v47 = vpop.f32.mrf.mxu3 }
 0x291   : > { %v1550_v19 = vadd.f32 %v1549_v47, %v1437_v61  ;;  %v1327_v27 = vadd.f32 %v1326_v63, %v3199_v54 }
 0x293   : > { %v1663_v59 = vadd.f32 %v1662_v17, %v1550_v19 }
 0x295   : > { %v1718_v45 = vmax.f32 %v1663_v59, 0.0 }
 0x296   : > { %v1439_v25 = vpop.f32.mrf.mxu2  ;;  %v1665_v62 = vpop.f32.mrf.mxu0 }
 0x297   : > { %1899 = vst [vmem:[%s3253_s5 + $0x109] sm:$0xff] %v1718_v45  ;;  %v1440_v11 = vadd.f32 %v1439_v25, %v1327_v27 }
 0x298   : > { %v1329_v60 = vpop.f32.mrf.mxu1  ;;  %v1552_v0 = vpop.f32.mrf.mxu3 }
 0x299   : > { %v1553_v53 = vadd.f32 %v1552_v0, %v1440_v11  ;;  %v1330_v23 = vadd.f32 %v1329_v60, %v3206_v40 }
 0x29b   : > { %v1666_v52 = vadd.f32 %v1665_v62, %v1553_v53 }
 0x29d   : > { %v1719_v18 = vmax.f32 %v1666_v52, 0.0 }
 0x29e   : > { %v1442_v58 = vpop.f32.mrf.mxu2  ;;  %v1668_v12 = vpop.f32.mrf.mxu0 }
 0x29f   : > { %1900 = vst [vmem:[%s3253_s5 + $0x111] sm:$0xff] %v1719_v18  ;;  %v1443_v16 = vadd.f32 %v1442_v58, %v1330_v23 }
 0x2a0   : > { %v1332_v22 = vpop.f32.mrf.mxu1  ;;  %v1555_v4 = vpop.f32.mrf.mxu3 }
 0x2a1   : > { %v1556_v54 = vadd.f32 %v1555_v4, %v1443_v16  ;;  %v1333_v41 = vadd.f32 %v1332_v22, %v3213_v43 }
 0x2a3   : > { %v1669_v28 = vadd.f32 %v1668_v12, %v1556_v54 }
 0x2a5   : > { %v1720_v56 = vmax.f32 %v1669_v28, 0.0 }
 0x2a6   : > { %v1445_v10 = vpop.f32.mrf.mxu2  ;;  %v1671_v3 = vpop.f32.mrf.mxu0 }
 0x2a7   : > { %1901 = vst [vmem:[%s3253_s5 + $0x121] sm:$0xff] %v1720_v56  ;;  %v1446_v57 = vadd.f32 %v1445_v10, %v1333_v41 }
 0x2a8   : > { %v1335_v26 = vpop.f32.mrf.mxu1  ;;  %v1558_v1 = vpop.f32.mrf.mxu3 }
 0x2a9   : > { %v1559_v40 = vadd.f32 %v1558_v1, %v1446_v57  ;;  %v1336_v51 = vadd.f32 %v1335_v26, %v3220_v20 }
 0x2ab   : > { %v1672_v21 = vadd.f32 %v1671_v3, %v1559_v40 }
 0x2ad   : > { %v1721_v36 = vmax.f32 %v1672_v21, 0.0 }
 0x2ae   : > { %v1448_v34 = vpop.f32.mrf.mxu2  ;;  %v1674_v31 = vpop.f32.mrf.mxu0 }
 0x2af   : > { %1902 = vst [vmem:[%s3253_s5 + $0x129] sm:$0xff] %v1721_v36  ;;  %v1449_v8 = vadd.f32 %v1448_v34, %v1336_v51 }
 0x2b0   : > { %v1338_v15 = vpop.f32.mrf.mxu1  ;;  %v1561_v35 = vpop.f32.mrf.mxu3 }
 0x2b1   : > { %v1562_v43 = vadd.f32 %v1561_v35, %v1449_v8  ;;  %v1339_v9 = vadd.f32 %v1338_v15, %v3227_v39 }
 0x2b3   : > { %v1675_v24 = vadd.f32 %v1674_v31, %v1562_v43 }
 0x2b5   : > { %v1722_v6 = vmax.f32 %v1675_v24, 0.0 }
 0x2b6   : > { %v1451_v14 = vpop.f32.mrf.mxu2  ;;  %v1677_v29 = vpop.f32.mrf.mxu0 }
 0x2b7   : > { %1903 = vst [vmem:[%s3253_s5 + $0x139] sm:$0xff] %v1722_v6  ;;  %v1452_v48 = vadd.f32 %v1451_v14, %v1339_v9 }
 0x2b8   : > { %v1341_v42 = vpop.f32.mrf.mxu1  ;;  %v1564_v49 = vpop.f32.mrf.mxu3 }
 0x2b9   : > { %v1565_v20 = vadd.f32 %v1564_v49, %v1452_v48  ;;  %v1342_v5 = vadd.f32 %v1341_v42, %v3234_v13 }
 0x2bb   : > { %v1678_v46 = vadd.f32 %v1677_v29, %v1565_v20 }
 0x2bd   : > { %v1723_v30 = vmax.f32 %v1678_v46, 0.0 }
 0x2be   : > { %v1454_v32 = vpop.f32.mrf.mxu2  ;;  %v1680_v7 = vpop.f32.mrf.mxu0 }
 0x2bf   : > { %1904 = vst [vmem:[%s3253_s5 + $0x141] sm:$0xff] %v1723_v30  ;;  %v1455_v37 = vadd.f32 %v1454_v32, %v1342_v5 }
 0x2c0   : > { %v1344_v50 = vpop.f32.mrf.mxu1  ;;  %v1567_v17 = vpop.f32.mrf.mxu3 }
 0x2c1   : > { %v1568_v39 = vadd.f32 %v1567_v17, %v1455_v37  ;;  %v1345_v63 = vadd.f32 %v1344_v50, %v3241_v33 }
 0x2c3   : > { %v1681_v61 = vadd.f32 %v1680_v7, %v1568_v39 }
 0x2c5   : > { %v1724_v47 = vmax.f32 %v1681_v61, 0.0 }
 0x2c6   : > { %v1457_v19 = vpop.f32.mrf.mxu2  ;;  %v1683_v59 = vpop.f32.mrf.mxu0 }
 0x2c7   : > { %1905 = vst [vmem:[%s3253_s5 + $0x151] sm:$0xff] %v1724_v47  ;;  %v1458_v27 = vadd.f32 %v1457_v19, %v1345_v63 }
 0x2c8   : > { %v1347_v45 = vpop.f32.mrf.mxu1  ;;  %v1570_v25 = vpop.f32.mrf.mxu3 }
 0x2c9   : > { %v1571_v13 = vadd.f32 %v1570_v25, %v1458_v27  ;;  %v1348_v11 = vadd.f32 %v1347_v45, %v3255_v2 }
 0x2cb   : > { %v1684_v62 = vadd.f32 %v1683_v59, %v1571_v13 }
 0x2cd   : > { %v1725_v60 = vmax.f32 %v1684_v62, 0.0 }
 0x2ce   : > { %v1460_v0 = vpop.f32.mrf.mxu2  ;;  %v1686_v53 = vpop.f32.mrf.mxu0 }
 0x2cf   : > { %1906 = vst [vmem:[%s3253_s5 + $0x159] sm:$0xff] %v1725_v60  ;;  %v1461_v52 = vadd.f32 %v1460_v0, %v1348_v11 }
 0x2d0   : > { %v1350_v23 = vpop.f32.mrf.mxu1  ;;  %v1573_v18 = vpop.f32.mrf.mxu3 }
 0x2d1   : > { %v1574_v33 = vadd.f32 %v1573_v18, %v1461_v52  ;;  %v1351_v12 = vadd.f32 %v1350_v23, %v3272_v44 }
 0x2d3   : > { %v1687_v58 = vadd.f32 %v1686_v53, %v1574_v33 }
 0x2d5   : > { %v1726_v16 = vmax.f32 %v1687_v58, 0.0 }
 0x2d6   : > { %v1463_v22 = vpop.f32.mrf.mxu2  ;;  %v1689_v4 = vpop.f32.mrf.mxu0 }
 0x2d7   : > { %1907 = vst [vmem:[%s3253_s5 + $0x169] sm:$0xff] %v1726_v16  ;;  %v1464_v54 = vadd.f32 %v1463_v22, %v1351_v12 }
 0x2d8   : > { %v1353_v28 = vpop.f32.mrf.mxu1  ;;  %v1576_v41 = vpop.f32.mrf.mxu3 }
 0x2d9   : > { %v1577_v2 = vadd.f32 %v1576_v41, %v1464_v54  ;;  %v1354_v10 = vadd.f32 %v1353_v28, %v3295_v38 }
 0x2db   : > { %v1690_v56 = vadd.f32 %v1689_v4, %v1577_v2 }
 0x2dd   : > { %v1727_v3 = vmax.f32 %v1690_v56, 0.0 }
 0x2de   : > { %v1466_v57 = vpop.f32.mrf.mxu2  ;;  %v1692_v26 = vpop.f32.mrf.mxu0 }
 0x2df   : > { %1908 = vst [vmem:[%s3253_s5 + $0x171] sm:$0xff] %v1727_v3  ;;  %v1467_v1 = vadd.f32 %v1466_v57, %v1354_v10 }
 0x2e0   : > { %v1579_v40 = vpop.f32.mrf.mxu3  ;;  %v1356_v21 = vpop.f32.mrf.mxu1 }
 0x2e1   : > { %v1580_v44 = vadd.f32 %v1579_v40, %v1467_v1  ;;  %v1357_v36 = vadd.f32 %v1356_v21, %v3318_v55 }
 0x2e3   : > { %v1693_v51 = vadd.f32 %v1692_v26, %v1580_v44 }
 0x2e5   : > { %v1728_v34 = vmax.f32 %v1693_v51, 0.0 }
 0x2e6   : > { %v1469_v31 = vpop.f32.mrf.mxu2  ;;  %v1695_v35 = vpop.f32.mrf.mxu0 }
 0x2e7   : > { %1909 = vst [vmem:[%s3253_s5 + $0x181] sm:$0xff] %v1728_v34  ;;  %v1470_v8 = vadd.f32 %v1469_v31, %v1357_v36 }
 0x2e8   : > { %v1582_v15 = vpop.f32.mrf.mxu3 }
 0x2e9   : > { %v1583_v43 = vadd.f32 %v1582_v15, %v1470_v8 }
 0x2eb   : > { %v1696_v38 = vadd.f32 %v1695_v35, %v1583_v43 }
 0x2ed   : > { %v1729_v24 = vmax.f32 %v1696_v38, 0.0 }
 0x2ef   : > { %1910 = vst [vmem:[%s3253_s5 + $0x189] sm:$0xff] %v1729_v24 }
 0x2f0 PF: > { %s13_s12 = sadd.s32 1, %s2007_s12  }
 0x2f1   : > { %p10_p4 = scmp.ge.s32.totalorder %s13_s12, 4  }
 0x2f3   :  { %12 = sbr.rel (!%p10_p4) target bundleno = 1 (0x1), region = 63 }

</bundles_post_ra>
